<compile_context>
chip_gen: v5e
topology: v5e:2x2
jax: 0.10.0
libtpu: 0.0.40
codegen_flags: <defaults>
</compile_context>

<pallas_src>
import math

import jax
import jax.numpy as jnp
from jax import lax
from jax.experimental import pallas as pl
from jax.experimental.pallas import tpu as pltpu


def _retainex_kernel(x_ref, e2_ref, wih_ref, bih_ref, whh_ref, wa_ref, wb_ref,
                     wout_ref, bout_ref, out_ref,
                     xp_ref, h_ref, c_ref, m_ref, l_ref, acc_ref):
    si = pl.program_id(1)                       # sequence-tile index
    last_si = pl.num_programs(1) - 1
    t_seq, t_b, f_in = x_ref.shape
    d = e2_ref.shape[2]
    d2 = 2 * d
    g_cols = whh_ref.shape[1]                   # 8 * d

    # ---- per-(batch-tile) state init at the first sequence tile ----
    @pl.when(si == 0)
    def _():
        h_ref[...] = jnp.zeros_like(h_ref)
        c_ref[...] = jnp.zeros_like(c_ref)
        m_ref[...] = jnp.full_like(m_ref, -jnp.inf)
        l_ref[...] = jnp.zeros_like(l_ref)
        acc_ref[...] = jnp.zeros_like(acc_ref)

    # ---- hoisted input-to-hidden projection for the whole tile ----
    # One (Tseq*Tb, d+3) @ (d+3, 8d) matmul (biases folded) replaces 2*Tseq
    # tiny per-step matmuls on the serial recurrence path.
    x_flat = x_ref[...].reshape(t_seq * t_b, f_in)
    xp = jnp.dot(x_flat, wih_ref[...], preferred_element_type=jnp.float32)
    xp_ref[...] = (xp + bih_ref[...]).reshape(t_seq, t_b, g_cols)

    whh = whh_ref[...]      # (2d, 8d) bf16, block-diagonal, gate-major columns
    wa = wa_ref[...]        # (1, 2d) f32, zeros on the h2 half
    wb = wb_ref[...]        # (2d, d) bf16, zeros on the h1 rows

    def step(t, carry):
        h, c, m, l, acc = carry                 # h/c hold [h1|h2] / [c1|c2]
        # single fused hidden->gates matmul for both LSTMs (bf16 in, f32 acc)
        gates = xp_ref[t] + jnp.dot(h.astype(jnp.bfloat16), whh,
                                    preferred_element_type=jnp.float32)
        # gate blocks are 2d wide (both LSTMs side by side): i | f | g | o
        gi = jax.nn.sigmoid(gates[:, 0:d2])
        gf = jax.nn.sigmoid(gates[:, d2:2 * d2])
        gg = jnp.tanh(gates[:, 2 * d2:3 * d2])
        go = jax.nn.sigmoid(gates[:, 3 * d2:4 * d2])
        c_new = gf * c + gi * gg
        h_new = go * jnp.tanh(c_new)
        # attention logit: VPU multiply + lane reduce (wa zero on the h2 half)
        e_t = jnp.sum(h_new * wa, axis=-1, keepdims=True)          # (Tb, 1)
        # beta = tanh(Wb h2): wb is zero on the h1 rows, so no slicing needed
        beta = jnp.tanh(jnp.dot(h_new.astype(jnp.bfloat16), wb,
                                preferred_element_type=jnp.float32))  # (Tb, d)
        v_t = e2_ref[t] * beta
        # online softmax over time fused with the alpha-weighted sum
        m_new = jnp.maximum(m, e_t)
        scale = jnp.exp(m - m_new)
        p = jnp.exp(e_t - m_new)
        return (h_new, c_new, m_new, scale * l + p, scale * acc + p * v_t)

    carry = (h_ref[...], c_ref[...], m_ref[...], l_ref[...], acc_ref[...])
    h, c, m, l, acc = lax.fori_loop(0, t_seq, step, carry, unroll=True)
    h_ref[...] = h
    c_ref[...] = c
    m_ref[...] = m
    l_ref[...] = l
    acc_ref[...] = acc

    # ---- finalize: ctx = sum_t alpha_t * e2_t * beta_t ; output projection ----
    @pl.when(si == last_si)
    def _():
        ctx = acc * pl.reciprocal(l, approx=True)                  # (Tb, d)
        out_ref[...] = (jnp.dot(ctx, wout_ref[...],
                                preferred_element_type=jnp.float32)
                        + bout_ref[...])
    # TODO(synk): nn.Dropout is identity in eval mode; omitted here.


def _pick_tile(n, cap):
    """Largest divisor of n that is <= cap (keeps the inner unroll bounded)."""
    for t in range(min(n, cap), 0, -1):
        if n % t == 0:
            return t
    return 1


def _pack_weights(params, d):
    f32 = jnp.float32
    # input-to-hidden: columns gate-major, LSTM-minor -> [i1 i2|f1 f2|g1 g2|o1 o2]
    w1ih = params['W1_ih'].T.reshape(d + 3, 4, d)
    w2ih = params['W2_ih'].T.reshape(d + 3, 4, d)
    wih_cat = jnp.stack([w1ih, w2ih], axis=2).reshape(d + 3, 8 * d).astype(f32)
    b1 = (params['b1_ih'] + params['b1_hh']).reshape(4, d)
    b2 = (params['b2_ih'] + params['b2_hh']).reshape(4, d)
    bih_cat = jnp.stack([b1, b2], axis=1).reshape(1, 8 * d).astype(f32)
    # hidden-to-hidden: block-diagonal over [h1 | h2], same column ordering
    w1hh = params['W1_hh'].T.reshape(d, 4, d)
    w2hh = params['W2_hh'].T.reshape(d, 4, d)
    zero = jnp.zeros((d, 4, d), f32)
    top = jnp.stack([w1hh, zero], axis=2).reshape(d, 8 * d)
    bot = jnp.stack([zero, w2hh], axis=2).reshape(d, 8 * d)
    whh_cat = jnp.concatenate([top, bot], axis=0).astype(jnp.bfloat16)
    # attention / beta / output projections, padded to avoid in-loop slicing
    wa_pad = jnp.concatenate([params['wa'], jnp.zeros((1, d), f32)], axis=1)
    wb_cat = jnp.concatenate([jnp.zeros((d, d), f32), params['Wb'].T],
                             axis=0).astype(jnp.bfloat16)
    wout_pad = jnp.zeros((d, 128), f32).at[:, :2].set(params['Wout'].T)
    bout_pad = jnp.zeros((1, 128), f32).at[:, :2].set(params['bout'])
    return wih_cat, bih_cat, whh_cat, wa_pad, wb_cat, wout_pad, bout_pad


def init_params(key, vocab_size, d_model):
    keys = jax.random.split(key, 16)

    def uni(k, shape, bound):
        return jax.random.uniform(k, shape, jnp.float32, -bound, bound)

    kd = 1.0 / math.sqrt(d_model)
    emb1 = jax.random.normal(keys[0], (vocab_size + 1, d_model), jnp.float32)
    emb2 = jax.random.normal(keys[1], (vocab_size + 1, d_model), jnp.float32)
    # padding_idx=-1 -> last row is the padding row (zeros)
    emb1 = emb1.at[vocab_size].set(0.0)
    emb2 = emb2.at[vocab_size].set(0.0)

    return dict(
        emb1=emb1,
        emb2=emb2,
        W1_ih=uni(keys[2], (4 * d_model, d_model + 3), kd),
        W1_hh=uni(keys[3], (4 * d_model, d_model), kd),
        b1_ih=uni(keys[4], (4 * d_model,), kd),
        b1_hh=uni(keys[5], (4 * d_model,), kd),
        W2_ih=uni(keys[6], (4 * d_model, d_model + 3), kd),
        W2_hh=uni(keys[7], (4 * d_model, d_model), kd),
        b2_ih=uni(keys[8], (4 * d_model,), kd),
        b2_hh=uni(keys[9], (4 * d_model,), kd),
        wa=uni(keys[10], (1, d_model), kd),        # Linear(d, 1, bias=False)
        Wb=uni(keys[11], (d_model, d_model), kd),  # Linear(d, d, bias=False)
        Wout=uni(keys[12], (2, d_model), kd),      # output_layer weight
        bout=uni(keys[13], (2,), kd),              # output_layer bias
    )


def retainex_forward(params, input_seqs, masks, lengths, time_step, code_masks):
    # masks / lengths / code_masks mirror the PyTorch signature but are unused.
    del masks, lengths, code_masks
    d = params['emb1'].shape[1]
    b, seq, _ = input_seqs.shape

    # ---- JAX glue: embedding gather-sum + date features, built time-major so
    # no full-activation transpose is needed (only indices / time_step). ----
    idx_t = jnp.transpose(input_seqs, (1, 0, 2))                  # (seq, b, codes)
    emb1 = jnp.take(params['emb1'], idx_t, axis=0).sum(axis=2)    # (seq, b, d)
    emb2 = jnp.take(params['emb2'], idx_t, axis=0).sum(axis=2)    # (seq, b, d)
    ts = jnp.transpose(time_step).astype(jnp.float32)             # (seq, b)
    dates = jnp.stack([ts, 1.0 / (ts + 1.0), 1.0 / jnp.log(math.e + ts)], axis=2)
    x = jnp.concatenate([emb1, dates], axis=2)                    # (seq, b, d+3)

    # pad batch to a multiple of 8 sublanes (padded rows are dropped at the end)
    b_pad = -(-b // 8) * 8
    if b_pad != b:
        x = jnp.pad(x, ((0, 0), (0, b_pad - b), (0, 0)))
        emb2 = jnp.pad(emb2, ((0, 0), (0, b_pad - b), (0, 0)))

    (wih_cat, bih_cat, whh_cat, wa_pad, wb_cat,
     wout_pad, bout_pad) = _pack_weights(params, d)

    t_seq = _pick_tile(seq, 16)         # short unrolled inner loop per grid tile
    t_b = math.gcd(b_pad, 128)          # batch tile (multiple of 8)
    grid = (b_pad // t_b, seq // t_seq)

    # rough VMEM budget: double-buffered streams + resident weights + scratch
    f32b, bf16b = 4, 2
    est = (2 * (t_seq * t_b * (d + 3) + t_seq * t_b * d) * f32b
           + 2 * ((d + 3) * 8 * d + 8 * d + 2 * d + d * 128 + 128) * f32b
           + 2 * (2 * d * 8 * d + 2 * d * d) * bf16b
           + 2 * t_b * 128 * f32b
           + (t_seq * t_b * 8 * d + t_b * (5 * d + 2)) * f32b)
    vmem_limit = int(min(64 * 2 ** 20, max(8 * 2 ** 20, 4 * est)))

    out = pl.pallas_call(
        _retainex_kernel,
        out_shape=jax.ShapeDtypeStruct((b_pad, 128), jnp.float32),
        grid_spec=pltpu.PrefetchScalarGridSpec(
            num_scalar_prefetch=0,
            grid=grid,
            in_specs=[
                pl.BlockSpec((t_seq, t_b, d + 3), lambda bi, si: (si, bi, 0)),
                pl.BlockSpec((t_seq, t_b, d), lambda bi, si: (si, bi, 0)),
                pl.BlockSpec((d + 3, 8 * d), lambda bi, si: (0, 0)),
                pl.BlockSpec((1, 8 * d), lambda bi, si: (0, 0)),
                pl.BlockSpec((2 * d, 8 * d), lambda bi, si: (0, 0)),
                pl.BlockSpec((1, 2 * d), lambda bi, si: (0, 0)),
                pl.BlockSpec((2 * d, d), lambda bi, si: (0, 0)),
                pl.BlockSpec((d, 128), lambda bi, si: (0, 0)),
                pl.BlockSpec((1, 128), lambda bi, si: (0, 0)),
            ],
            out_specs=pl.BlockSpec((t_b, 128), lambda bi, si: (bi, 0)),
            scratch_shapes=[
                pltpu.VMEM((t_seq, t_b, 8 * d), jnp.float32),   # x projection
                pltpu.VMEM((t_b, 2 * d), jnp.float32),          # h1 | h2
                pltpu.VMEM((t_b, 2 * d), jnp.float32),          # c1 | c2
                pltpu.VMEM((t_b, 1), jnp.float32),              # softmax max
                pltpu.VMEM((t_b, 1), jnp.float32),              # softmax denom
                pltpu.VMEM((t_b, d), jnp.float32),              # weighted sum
            ],
        ),
        compiler_params=pltpu.CompilerParams(
            dimension_semantics=("parallel", "arbitrary"),
            vmem_limit_bytes=vmem_limit,
        ),
    )(x, emb2, wih_cat, bih_cat, whh_cat, wa_pad, wb_cat, wout_pad, bout_pad)
    return out[:b, :2]


def retainex_reference(params, input_seqs, time_step):
    """Pure-JAX f32 reference mirroring the PyTorch forward exactly."""
    emb1 = jnp.take(params['emb1'], input_seqs, axis=0).sum(axis=2)
    emb2 = jnp.take(params['emb2'], input_seqs, axis=0).sum(axis=2)
    ts = time_step.astype(jnp.float32)
    dates = jnp.stack([ts, 1.0 / (ts + 1.0), 1.0 / jnp.log(math.e + ts)], axis=2)
    x = jnp.concatenate([emb1, dates], axis=2)
    b, seq, d = emb1.shape

    def run_lstm(x, wih, whh, bih, bhh):
        def cell(carry, x_t):
            h, c = carry
            gates = x_t @ wih.T + h @ whh.T + bih + bhh
            i, f, g, o = jnp.split(gates, 4, axis=-1)
            i = jax.nn.sigmoid(i); f = jax.nn.sigmoid(f)
            g = jnp.tanh(g); o = jax.nn.sigmoid(o)
            c = f * c + i * g
            h = o * jnp.tanh(c)
            return (h, c), h
        h0 = jnp.zeros((b, d), jnp.float32)
        c0 = jnp.zeros((b, d), jnp.float32)
        _, hs = lax.scan(cell, (h0, c0), jnp.transpose(x, (1, 0, 2)))
        return jnp.transpose(hs, (1, 0, 2))

    o1 = run_lstm(x, params['W1_ih'], params['W1_hh'], params['b1_ih'], params['b1_hh'])
    o2 = run_lstm(x, params['W2_ih'], params['W2_hh'], params['b2_ih'], params['b2_hh'])
    E = (o1 @ params['wa'].T)[..., 0]
    alpha = jax.nn.softmax(E, axis=1)
    beta = jnp.tanh(o2 @ params['Wb'].T)
    v = emb2 * beta * alpha[..., None]
    out = v.sum(axis=1)
    return out @ params['Wout'].T + params['bout']


if __name__ == "__main__":
    vocab_size = 50
    d_model = 32
    b, seq, n_codes = 2, 8, 4

    key = jax.random.PRNGKey(0)
    k_param, k_seq, k_time = jax.random.split(key, 3)
    params = init_params(k_param, vocab_size, d_model)

    input_seqs = jax.random.randint(k_seq, (b, seq, n_codes), 0, vocab_size,
                                    dtype=jnp.int32)
    # pad a couple of code slots with the padding index (== vocab_size, i.e. -1)
    input_seqs = input_seqs.at[0, -1, -1].set(vocab_size)
    input_seqs = input_seqs.at[1, -1, :].set(vocab_size)

    time_step = jax.random.uniform(k_time, (b, seq), jnp.float32, 0.0, 50.0)
    masks = jnp.ones((b, seq), jnp.float32)                 # unused by forward
    lengths = jnp.full((b,), seq, jnp.int32)                # unused by forward
    code_masks = jnp.ones((b, seq, n_codes), jnp.float32)   # unused by forward

    out = retainex_forward(params, input_seqs, masks, lengths, time_step, code_masks)
    out = jax.block_until_ready(out)

    ref = retainex_reference(params, input_seqs, time_step)
    ref = jax.block_until_ready(ref)

    assert out.shape == (b, 2), out.shape
    # bf16 operands are used for the in-loop (hidden->gates, Wb) matmuls;
    # 2e-2 tolerance covers that while still catching real bugs.
    assert jnp.allclose(out, ref, rtol=2e-2, atol=2e-2), (out, ref)
    print("KERNEL_OK")
</pallas_src>

<mosaic_0001>
module attributes {stable_mosaic.version = 11 : i64} {
  func.func @_retainex_kernel(%arg0: i32, %arg1: i32, %arg2: memref<8x8x35xf32, #tpu.memory_space<vmem>>, %arg3: memref<8x8x32xf32, #tpu.memory_space<vmem>>, %arg4: memref<35x256xf32, #tpu.memory_space<vmem>>, %arg5: memref<1x256xf32, #tpu.memory_space<vmem>>, %arg6: memref<64x256xbf16, #tpu.memory_space<vmem>>, %arg7: memref<1x64xf32, #tpu.memory_space<vmem>>, %arg8: memref<64x32xbf16, #tpu.memory_space<vmem>>, %arg9: memref<32x128xf32, #tpu.memory_space<vmem>>, %arg10: memref<1x128xf32, #tpu.memory_space<vmem>>, %arg11: memref<8x128xf32, #tpu.memory_space<vmem>>, %arg12: memref<8x8x256xf32, #tpu.memory_space<vmem>>, %arg13: memref<8x64xf32, #tpu.memory_space<vmem>>, %arg14: memref<8x64xf32, #tpu.memory_space<vmem>>, %arg15: memref<8x1xf32, #tpu.memory_space<vmem>>, %arg16: memref<8x1xf32, #tpu.memory_space<vmem>>, %arg17: memref<8x32xf32, #tpu.memory_space<vmem>>) attributes {dimension_semantics = [#tpu.dimension_semantics<parallel>, #tpu.dimension_semantics<arbitrary>], iteration_bounds = array<i64: 1, 1>, scalar_prefetch = 0 : i64, scratch_operands = 6 : i64, tpu.core_type = #tpu.core_type<tc>, window_params = [{transform_indices = @transform_0, window_bounds = array<i64: 8, 8, 35>}, {transform_indices = @transform_1, window_bounds = array<i64: 8, 8, 32>}, {pipeline_mode = #tpu.pipeline_mode<synchronous>, transform_indices = @transform_2, window_bounds = array<i64: 35, 256>}, {pipeline_mode = #tpu.pipeline_mode<synchronous>, transform_indices = @transform_3, window_bounds = array<i64: 1, 256>}, {pipeline_mode = #tpu.pipeline_mode<synchronous>, transform_indices = @transform_4, window_bounds = array<i64: 64, 256>}, {pipeline_mode = #tpu.pipeline_mode<synchronous>, transform_indices = @transform_5, window_bounds = array<i64: 1, 64>}, {pipeline_mode = #tpu.pipeline_mode<synchronous>, transform_indices = @transform_6, window_bounds = array<i64: 64, 32>}, {pipeline_mode = #tpu.pipeline_mode<synchronous>, transform_indices = @transform_7, window_bounds = array<i64: 32, 128>}, {pipeline_mode = #tpu.pipeline_mode<synchronous>, transform_indices = @transform_8, window_bounds = array<i64: 1, 128>}, {transform_indices = @transform_9, window_bounds = array<i64: 8, 128>}]} {
    %c0_i32 = arith.constant 0 : i32
    %0 = arith.cmpi eq, %arg1, %c0_i32 : i32
    %1 = arith.extui %0 : i1 to i32
    %c0_i32_0 = arith.constant 0 : i32
    %2 = arith.cmpi ne, %1, %c0_i32_0 : i32
    scf.if %2 {
      %cst_119 = arith.constant 0.000000e+00 : f32
      %460 = vector.broadcast %cst_119 : f32 to vector<8x64xf32>
      %c0_120 = arith.constant 0 : index
      %c0_121 = arith.constant 0 : index
      %461 = vector.load %arg13[%c0_120, %c0_121] : memref<8x64xf32, #tpu.memory_space<vmem>>, vector<8x64xf32>
      tpu.vector_store %arg13[%c0_120, %c0_121], %460 {strides = array<i32>} : memref<8x64xf32, #tpu.memory_space<vmem>>, vector<8x64xf32>,
      %cst_122 = arith.constant 0.000000e+00 : f32
      %462 = vector.broadcast %cst_122 : f32 to vector<8x64xf32>
      %c0_123 = arith.constant 0 : index
      %c0_124 = arith.constant 0 : index
      %463 = vector.load %arg14[%c0_123, %c0_124] : memref<8x64xf32, #tpu.memory_space<vmem>>, vector<8x64xf32>
      tpu.vector_store %arg14[%c0_123, %c0_124], %462 {strides = array<i32>} : memref<8x64xf32, #tpu.memory_space<vmem>>, vector<8x64xf32>,
      %cst_125 = arith.constant 0xFF800000 : f32
      %464 = vector.broadcast %cst_125 : f32 to vector<8x1xf32>
      %c0_126 = arith.constant 0 : index
      %c0_127 = arith.constant 0 : index
      %465 = vector.load %arg15[%c0_126, %c0_127] : memref<8x1xf32, #tpu.memory_space<vmem>>, vector<8x1xf32>
      tpu.vector_store %arg15[%c0_126, %c0_127], %464 {strides = array<i32>} : memref<8x1xf32, #tpu.memory_space<vmem>>, vector<8x1xf32>,
      %cst_128 = arith.constant 0.000000e+00 : f32
      %466 = vector.broadcast %cst_128 : f32 to vector<8x1xf32>
      %c0_129 = arith.constant 0 : index
      %c0_130 = arith.constant 0 : index
      %467 = vector.load %arg16[%c0_129, %c0_130] : memref<8x1xf32, #tpu.memory_space<vmem>>, vector<8x1xf32>
      tpu.vector_store %arg16[%c0_129, %c0_130], %466 {strides = array<i32>} : memref<8x1xf32, #tpu.memory_space<vmem>>, vector<8x1xf32>,
      %cst_131 = arith.constant 0.000000e+00 : f32
      %468 = vector.broadcast %cst_131 : f32 to vector<8x32xf32>
      %c0_132 = arith.constant 0 : index
      %c0_133 = arith.constant 0 : index
      %469 = vector.load %arg17[%c0_132, %c0_133] : memref<8x32xf32, #tpu.memory_space<vmem>>, vector<8x32xf32>
      tpu.vector_store %arg17[%c0_132, %c0_133], %468 {strides = array<i32>} : memref<8x32xf32, #tpu.memory_space<vmem>>, vector<8x32xf32>,
    } else {
    }
    %c0 = arith.constant 0 : index
    %c0_1 = arith.constant 0 : index
    %c0_2 = arith.constant 0 : index
    %3 = vector.load %arg2[%c0, %c0_1, %c0_2] : memref<8x8x35xf32, #tpu.memory_space<vmem>>, vector<8x8x35xf32>
    %4 = vector.shape_cast %3 : vector<8x8x35xf32> to vector<64x35xf32>
    %c0_3 = arith.constant 0 : index
    %c0_4 = arith.constant 0 : index
    %5 = vector.load %arg4[%c0_3, %c0_4] : memref<35x256xf32, #tpu.memory_space<vmem>>, vector<35x256xf32>
    %cst = arith.constant dense<0.000000e+00> : vector<64x256xf32>
    %6 = tpu.matmul %4, %5, %cst {dimension_numbers = #tpu.dot_dimension_numbers<[1], [0], [0], [1], [0, 0, 1, 1], [], []>} : vector<64x35xf32>, vector<35x256xf32>, vector<64x256xf32> -> vector<64x256xf32>
    %c0_5 = arith.constant 0 : index
    %c0_6 = arith.constant 0 : index
    %7 = vector.load %arg5[%c0_5, %c0_6] : memref<1x256xf32, #tpu.memory_space<vmem>>, vector<1x256xf32>
    %8 = vector.broadcast %7 : vector<1x256xf32> to vector<64x256xf32>
    %9 = arith.addf %6, %8 : vector<64x256xf32>
    %10 = vector.shape_cast %9 : vector<64x256xf32> to vector<8x8x256xf32>
    %c0_7 = arith.constant 0 : index
    %c0_8 = arith.constant 0 : index
    %c0_9 = arith.constant 0 : index
    %11 = vector.load %arg12[%c0_7, %c0_8, %c0_9] : memref<8x8x256xf32, #tpu.memory_space<vmem>>, vector<8x8x256xf32>
    tpu.vector_store %arg12[%c0_7, %c0_8, %c0_9], %10 {strides = array<i32>} : memref<8x8x256xf32, #tpu.memory_space<vmem>>, vector<8x8x256xf32>,
    %c0_10 = arith.constant 0 : index
    %c0_11 = arith.constant 0 : index
    %12 = vector.load %arg6[%c0_10, %c0_11] : memref<64x256xbf16, #tpu.memory_space<vmem>>, vector<64x256xbf16>
    %c0_12 = arith.constant 0 : index
    %c0_13 = arith.constant 0 : index
    %13 = vector.load %arg7[%c0_12, %c0_13] : memref<1x64xf32, #tpu.memory_space<vmem>>, vector<1x64xf32>
    %c0_14 = arith.constant 0 : index
    %c0_15 = arith.constant 0 : index
    %14 = vector.load %arg8[%c0_14, %c0_15] : memref<64x32xbf16, #tpu.memory_space<vmem>>, vector<64x32xbf16>
    %c0_16 = arith.constant 0 : index
    %c0_17 = arith.constant 0 : index
    %15 = vector.load %arg13[%c0_16, %c0_17] : memref<8x64xf32, #tpu.memory_space<vmem>>, vector<8x64xf32>
    %c0_18 = arith.constant 0 : index
    %c0_19 = arith.constant 0 : index
    %16 = vector.load %arg14[%c0_18, %c0_19] : memref<8x64xf32, #tpu.memory_space<vmem>>, vector<8x64xf32>
    %c0_20 = arith.constant 0 : index
    %c0_21 = arith.constant 0 : index
    %17 = vector.load %arg15[%c0_20, %c0_21] : memref<8x1xf32, #tpu.memory_space<vmem>>, vector<8x1xf32>
    %c0_22 = arith.constant 0 : index
    %c0_23 = arith.constant 0 : index
    %18 = vector.load %arg16[%c0_22, %c0_23] : memref<8x1xf32, #tpu.memory_space<vmem>>, vector<8x1xf32>
    %c0_24 = arith.constant 0 : index
    %c0_25 = arith.constant 0 : index
    %19 = vector.load %arg17[%c0_24, %c0_25] : memref<8x32xf32, #tpu.memory_space<vmem>>, vector<8x32xf32>
    %c0_i32_26 = arith.constant 0 : i32
    %20 = arith.index_cast %c0_i32_26 : i32 to index
    %c0_27 = arith.constant 0 : index
    %c0_28 = arith.constant 0 : index
    %21 = vector.load %arg12[%20, %c0_27, %c0_28] : memref<8x8x256xf32, #tpu.memory_space<vmem>>, vector<1x8x256xf32>
    %22 = vector.shape_cast %21 : vector<1x8x256xf32> to vector<8x256xf32>
    %23 = arith.truncf %15 : vector<8x64xf32> to vector<8x64xbf16>
    %cst_29 = arith.constant dense<0.000000e+00> : vector<8x256xf32>
    %24 = tpu.matmul %23, %12, %cst_29 {dimension_numbers = #tpu.dot_dimension_numbers<[1], [0], [0], [1], [0, 0, 1, 1], [], []>} : vector<8x64xbf16>, vector<64x256xbf16>, vector<8x256xf32> -> vector<8x256xf32>
    %25 = arith.addf %22, %24 : vector<8x256xf32>
    %26 = vector.extract_strided_slice %25 {offsets = [0, 0], sizes = [8, 64], strides = [1, 1]} : vector<8x256xf32> to vector<8x64xf32>
    %27 = arith.negf %26 : vector<8x64xf32>
    %28 = math.exp %27 : vector<8x64xf32>
    %cst_30 = arith.constant 1.000000e+00 : f32
    %29 = vector.broadcast %cst_30 : f32 to vector<8x64xf32>
    %30 = arith.addf %29, %28 : vector<8x64xf32>
    %31 = arith.divf %29, %30 : vector<8x64xf32>
    %32 = vector.extract_strided_slice %25 {offsets = [0, 64], sizes = [8, 64], strides = [1, 1]} : vector<8x256xf32> to vector<8x64xf32>
    %33 = arith.negf %32 : vector<8x64xf32>
    %34 = math.exp %33 : vector<8x64xf32>
    %cst_31 = arith.constant 1.000000e+00 : f32
    %35 = vector.broadcast %cst_31 : f32 to vector<8x64xf32>
    %36 = arith.addf %35, %34 : vector<8x64xf32>
    %37 = arith.divf %35, %36 : vector<8x64xf32>
    %38 = vector.extract_strided_slice %25 {offsets = [0, 128], sizes = [8, 64], strides = [1, 1]} : vector<8x256xf32> to vector<8x64xf32>
    %39 = math.tanh %38 : vector<8x64xf32>
    %40 = vector.extract_strided_slice %25 {offsets = [0, 192], sizes = [8, 64], strides = [1, 1]} : vector<8x256xf32> to vector<8x64xf32>
    %41 = arith.negf %40 : vector<8x64xf32>
    %42 = math.exp %41 : vector<8x64xf32>
    %cst_32 = arith.constant 1.000000e+00 : f32
    %43 = vector.broadcast %cst_32 : f32 to vector<8x64xf32>
    %44 = arith.addf %43, %42 : vector<8x64xf32>
    %45 = arith.divf %43, %44 : vector<8x64xf32>
    %46 = arith.mulf %37, %16 : vector<8x64xf32>
    %47 = arith.mulf %31, %39 : vector<8x64xf32>
    %48 = arith.addf %46, %47 : vector<8x64xf32>
    %49 = math.tanh %48 : vector<8x64xf32>
    %50 = arith.mulf %45, %49 : vector<8x64xf32>
    %51 = vector.broadcast %13 : vector<1x64xf32> to vector<8x64xf32>
    %52 = arith.mulf %50, %51 : vector<8x64xf32>
    %cst_33 = arith.constant dense<0.000000e+00> : vector<8xf32>
    %53 = vector.multi_reduction <add>, %52, %cst_33 [1] : vector<8x64xf32> to vector<8xf32>
    %54 = vector.shape_cast %53 : vector<8xf32> to vector<8x1xf32>
    %55 = arith.truncf %50 : vector<8x64xf32> to vector<8x64xbf16>
    %cst_34 = arith.constant dense<0.000000e+00> : vector<8x32xf32>
    %56 = tpu.matmul %55, %14, %cst_34 {dimension_numbers = #tpu.dot_dimension_numbers<[1], [0], [0], [1], [0, 0, 1, 1], [], []>} : vector<8x64xbf16>, vector<64x32xbf16>, vector<8x32xf32> -> vector<8x32xf32>
    %57 = math.tanh %56 : vector<8x32xf32>
    %58 = arith.index_cast %c0_i32_26 : i32 to index
    %c0_35 = arith.constant 0 : index
    %c0_36 = arith.constant 0 : index
    %59 = vector.load %arg3[%58, %c0_35, %c0_36] : memref<8x8x32xf32, #tpu.memory_space<vmem>>, vector<1x8x32xf32>
    %60 = vector.shape_cast %59 : vector<1x8x32xf32> to vector<8x32xf32>
    %61 = arith.mulf %60, %57 : vector<8x32xf32>
    %62 = arith.maximumf %17, %54 : vector<8x1xf32>
    %63 = arith.subf %17, %62 : vector<8x1xf32>
    %64 = math.exp %63 : vector<8x1xf32>
    %65 = arith.subf %54, %62 : vector<8x1xf32>
    %66 = math.exp %65 : vector<8x1xf32>
    %67 = arith.mulf %64, %18 : vector<8x1xf32>
    %68 = arith.addf %67, %66 : vector<8x1xf32>
    %69 = vector.broadcast %64 : vector<8x1xf32> to vector<8x32xf32>
    %70 = arith.mulf %69, %19 : vector<8x32xf32>
    %71 = vector.broadcast %66 : vector<8x1xf32> to vector<8x32xf32>
    %72 = arith.mulf %71, %61 : vector<8x32xf32>
    %73 = arith.addf %70, %72 : vector<8x32xf32>
    %c1_i32 = arith.constant 1 : i32
    %74 = arith.index_cast %c1_i32 : i32 to index
    %c0_37 = arith.constant 0 : index
    %c0_38 = arith.constant 0 : index
    %75 = vector.load %arg12[%74, %c0_37, %c0_38] : memref<8x8x256xf32, #tpu.memory_space<vmem>>, vector<1x8x256xf32>
    %76 = vector.shape_cast %75 : vector<1x8x256xf32> to vector<8x256xf32>
    %77 = arith.truncf %50 : vector<8x64xf32> to vector<8x64xbf16>
    %cst_39 = arith.constant dense<0.000000e+00> : vector<8x256xf32>
    %78 = tpu.matmul %77, %12, %cst_39 {dimension_numbers = #tpu.dot_dimension_numbers<[1], [0], [0], [1], [0, 0, 1, 1], [], []>} : vector<8x64xbf16>, vector<64x256xbf16>, vector<8x256xf32> -> vector<8x256xf32>
    %79 = arith.addf %76, %78 : vector<8x256xf32>
    %80 = vector.extract_strided_slice %79 {offsets = [0, 0], sizes = [8, 64], strides = [1, 1]} : vector<8x256xf32> to vector<8x64xf32>
    %81 = arith.negf %80 : vector<8x64xf32>
    %82 = math.exp %81 : vector<8x64xf32>
    %cst_40 = arith.constant 1.000000e+00 : f32
    %83 = vector.broadcast %cst_40 : f32 to vector<8x64xf32>
    %84 = arith.addf %83, %82 : vector<8x64xf32>
    %85 = arith.divf %83, %84 : vector<8x64xf32>
    %86 = vector.extract_strided_slice %79 {offsets = [0, 64], sizes = [8, 64], strides = [1, 1]} : vector<8x256xf32> to vector<8x64xf32>
    %87 = arith.negf %86 : vector<8x64xf32>
    %88 = math.exp %87 : vector<8x64xf32>
    %cst_41 = arith.constant 1.000000e+00 : f32
    %89 = vector.broadcast %cst_41 : f32 to vector<8x64xf32>
    %90 = arith.addf %89, %88 : vector<8x64xf32>
    %91 = arith.divf %89, %90 : vector<8x64xf32>
    %92 = vector.extract_strided_slice %79 {offsets = [0, 128], sizes = [8, 64], strides = [1, 1]} : vector<8x256xf32> to vector<8x64xf32>
    %93 = math.tanh %92 : vector<8x64xf32>
    %94 = vector.extract_strided_slice %79 {offsets = [0, 192], sizes = [8, 64], strides = [1, 1]} : vector<8x256xf32> to vector<8x64xf32>
    %95 = arith.negf %94 : vector<8x64xf32>
    %96 = math.exp %95 : vector<8x64xf32>
    %cst_42 = arith.constant 1.000000e+00 : f32
    %97 = vector.broadcast %cst_42 : f32 to vector<8x64xf32>
    %98 = arith.addf %97, %96 : vector<8x64xf32>
    %99 = arith.divf %97, %98 : vector<8x64xf32>
    %100 = arith.mulf %91, %48 : vector<8x64xf32>
    %101 = arith.mulf %85, %93 : vector<8x64xf32>
    %102 = arith.addf %100, %101 : vector<8x64xf32>
    %103 = math.tanh %102 : vector<8x64xf32>
    %104 = arith.mulf %99, %103 : vector<8x64xf32>
    %105 = vector.broadcast %13 : vector<1x64xf32> to vector<8x64xf32>
    %106 = arith.mulf %104, %105 : vector<8x64xf32>
    %cst_43 = arith.constant dense<0.000000e+00> : vector<8xf32>
    %107 = vector.multi_reduction <add>, %106, %cst_43 [1] : vector<8x64xf32> to vector<8xf32>
    %108 = vector.shape_cast %107 : vector<8xf32> to vector<8x1xf32>
    %109 = arith.truncf %104 : vector<8x64xf32> to vector<8x64xbf16>
    %cst_44 = arith.constant dense<0.000000e+00> : vector<8x32xf32>
    %110 = tpu.matmul %109, %14, %cst_44 {dimension_numbers = #tpu.dot_dimension_numbers<[1], [0], [0], [1], [0, 0, 1, 1], [], []>} : vector<8x64xbf16>, vector<64x32xbf16>, vector<8x32xf32> -> vector<8x32xf32>
    %111 = math.tanh %110 : vector<8x32xf32>
    %112 = arith.index_cast %c1_i32 : i32 to index
    %c0_45 = arith.constant 0 : index
    %c0_46 = arith.constant 0 : index
    %113 = vector.load %arg3[%112, %c0_45, %c0_46] : memref<8x8x32xf32, #tpu.memory_space<vmem>>, vector<1x8x32xf32>
    %114 = vector.shape_cast %113 : vector<1x8x32xf32> to vector<8x32xf32>
    %115 = arith.mulf %114, %111 : vector<8x32xf32>
    %116 = arith.maximumf %62, %108 : vector<8x1xf32>
    %117 = arith.subf %62, %116 : vector<8x1xf32>
    %118 = math.exp %117 : vector<8x1xf32>
    %119 = arith.subf %108, %116 : vector<8x1xf32>
    %120 = math.exp %119 : vector<8x1xf32>
    %121 = arith.mulf %118, %68 : vector<8x1xf32>
    %122 = arith.addf %121, %120 : vector<8x1xf32>
    %123 = vector.broadcast %118 : vector<8x1xf32> to vector<8x32xf32>
    %124 = arith.mulf %123, %73 : vector<8x32xf32>
    %125 = vector.broadcast %120 : vector<8x1xf32> to vector<8x32xf32>
    %126 = arith.mulf %125, %115 : vector<8x32xf32>
    %127 = arith.addf %124, %126 : vector<8x32xf32>
    %c2_i32 = arith.constant 2 : i32
    %128 = arith.index_cast %c2_i32 : i32 to index
    %c0_47 = arith.constant 0 : index
    %c0_48 = arith.constant 0 : index
    %129 = vector.load %arg12[%128, %c0_47, %c0_48] : memref<8x8x256xf32, #tpu.memory_space<vmem>>, vector<1x8x256xf32>
    %130 = vector.shape_cast %129 : vector<1x8x256xf32> to vector<8x256xf32>
    %131 = arith.truncf %104 : vector<8x64xf32> to vector<8x64xbf16>
    %cst_49 = arith.constant dense<0.000000e+00> : vector<8x256xf32>
    %132 = tpu.matmul %131, %12, %cst_49 {dimension_numbers = #tpu.dot_dimension_numbers<[1], [0], [0], [1], [0, 0, 1, 1], [], []>} : vector<8x64xbf16>, vector<64x256xbf16>, vector<8x256xf32> -> vector<8x256xf32>
    %133 = arith.addf %130, %132 : vector<8x256xf32>
    %134 = vector.extract_strided_slice %133 {offsets = [0, 0], sizes = [8, 64], strides = [1, 1]} : vector<8x256xf32> to vector<8x64xf32>
    %135 = arith.negf %134 : vector<8x64xf32>
    %136 = math.exp %135 : vector<8x64xf32>
    %cst_50 = arith.constant 1.000000e+00 : f32
    %137 = vector.broadcast %cst_50 : f32 to vector<8x64xf32>
    %138 = arith.addf %137, %136 : vector<8x64xf32>
    %139 = arith.divf %137, %138 : vector<8x64xf32>
    %140 = vector.extract_strided_slice %133 {offsets = [0, 64], sizes = [8, 64], strides = [1, 1]} : vector<8x256xf32> to vector<8x64xf32>
    %141 = arith.negf %140 : vector<8x64xf32>
    %142 = math.exp %141 : vector<8x64xf32>
    %cst_51 = arith.constant 1.000000e+00 : f32
    %143 = vector.broadcast %cst_51 : f32 to vector<8x64xf32>
    %144 = arith.addf %143, %142 : vector<8x64xf32>
    %145 = arith.divf %143, %144 : vector<8x64xf32>
    %146 = vector.extract_strided_slice %133 {offsets = [0, 128], sizes = [8, 64], strides = [1, 1]} : vector<8x256xf32> to vector<8x64xf32>
    %147 = math.tanh %146 : vector<8x64xf32>
    %148 = vector.extract_strided_slice %133 {offsets = [0, 192], sizes = [8, 64], strides = [1, 1]} : vector<8x256xf32> to vector<8x64xf32>
    %149 = arith.negf %148 : vector<8x64xf32>
    %150 = math.exp %149 : vector<8x64xf32>
    %cst_52 = arith.constant 1.000000e+00 : f32
    %151 = vector.broadcast %cst_52 : f32 to vector<8x64xf32>
    %152 = arith.addf %151, %150 : vector<8x64xf32>
    %153 = arith.divf %151, %152 : vector<8x64xf32>
    %154 = arith.mulf %145, %102 : vector<8x64xf32>
    %155 = arith.mulf %139, %147 : vector<8x64xf32>
    %156 = arith.addf %154, %155 : vector<8x64xf32>
    %157 = math.tanh %156 : vector<8x64xf32>
    %158 = arith.mulf %153, %157 : vector<8x64xf32>
    %159 = vector.broadcast %13 : vector<1x64xf32> to vector<8x64xf32>
    %160 = arith.mulf %158, %159 : vector<8x64xf32>
    %cst_53 = arith.constant dense<0.000000e+00> : vector<8xf32>
    %161 = vector.multi_reduction <add>, %160, %cst_53 [1] : vector<8x64xf32> to vector<8xf32>
    %162 = vector.shape_cast %161 : vector<8xf32> to vector<8x1xf32>
    %163 = arith.truncf %158 : vector<8x64xf32> to vector<8x64xbf16>
    %cst_54 = arith.constant dense<0.000000e+00> : vector<8x32xf32>
    %164 = tpu.matmul %163, %14, %cst_54 {dimension_numbers = #tpu.dot_dimension_numbers<[1], [0], [0], [1], [0, 0, 1, 1], [], []>} : vector<8x64xbf16>, vector<64x32xbf16>, vector<8x32xf32> -> vector<8x32xf32>
    %165 = math.tanh %164 : vector<8x32xf32>
    %166 = arith.index_cast %c2_i32 : i32 to index
    %c0_55 = arith.constant 0 : index
    %c0_56 = arith.constant 0 : index
    %167 = vector.load %arg3[%166, %c0_55, %c0_56] : memref<8x8x32xf32, #tpu.memory_space<vmem>>, vector<1x8x32xf32>
    %168 = vector.shape_cast %167 : vector<1x8x32xf32> to vector<8x32xf32>
    %169 = arith.mulf %168, %165 : vector<8x32xf32>
    %170 = arith.maximumf %116, %162 : vector<8x1xf32>
    %171 = arith.subf %116, %170 : vector<8x1xf32>
    %172 = math.exp %171 : vector<8x1xf32>
    %173 = arith.subf %162, %170 : vector<8x1xf32>
    %174 = math.exp %173 : vector<8x1xf32>
    %175 = arith.mulf %172, %122 : vector<8x1xf32>
    %176 = arith.addf %175, %174 : vector<8x1xf32>
    %177 = vector.broadcast %172 : vector<8x1xf32> to vector<8x32xf32>
    %178 = arith.mulf %177, %127 : vector<8x32xf32>
    %179 = vector.broadcast %174 : vector<8x1xf32> to vector<8x32xf32>
    %180 = arith.mulf %179, %169 : vector<8x32xf32>
    %181 = arith.addf %178, %180 : vector<8x32xf32>
    %c3_i32 = arith.constant 3 : i32
    %182 = arith.index_cast %c3_i32 : i32 to index
    %c0_57 = arith.constant 0 : index
    %c0_58 = arith.constant 0 : index
    %183 = vector.load %arg12[%182, %c0_57, %c0_58] : memref<8x8x256xf32, #tpu.memory_space<vmem>>, vector<1x8x256xf32>
    %184 = vector.shape_cast %183 : vector<1x8x256xf32> to vector<8x256xf32>
    %185 = arith.truncf %158 : vector<8x64xf32> to vector<8x64xbf16>
    %cst_59 = arith.constant dense<0.000000e+00> : vector<8x256xf32>
    %186 = tpu.matmul %185, %12, %cst_59 {dimension_numbers = #tpu.dot_dimension_numbers<[1], [0], [0], [1], [0, 0, 1, 1], [], []>} : vector<8x64xbf16>, vector<64x256xbf16>, vector<8x256xf32> -> vector<8x256xf32>
    %187 = arith.addf %184, %186 : vector<8x256xf32>
    %188 = vector.extract_strided_slice %187 {offsets = [0, 0], sizes = [8, 64], strides = [1, 1]} : vector<8x256xf32> to vector<8x64xf32>
    %189 = arith.negf %188 : vector<8x64xf32>
    %190 = math.exp %189 : vector<8x64xf32>
    %cst_60 = arith.constant 1.000000e+00 : f32
    %191 = vector.broadcast %cst_60 : f32 to vector<8x64xf32>
    %192 = arith.addf %191, %190 : vector<8x64xf32>
    %193 = arith.divf %191, %192 : vector<8x64xf32>
    %194 = vector.extract_strided_slice %187 {offsets = [0, 64], sizes = [8, 64], strides = [1, 1]} : vector<8x256xf32> to vector<8x64xf32>
    %195 = arith.negf %194 : vector<8x64xf32>
    %196 = math.exp %195 : vector<8x64xf32>
    %cst_61 = arith.constant 1.000000e+00 : f32
    %197 = vector.broadcast %cst_61 : f32 to vector<8x64xf32>
    %198 = arith.addf %197, %196 : vector<8x64xf32>
    %199 = arith.divf %197, %198 : vector<8x64xf32>
    %200 = vector.extract_strided_slice %187 {offsets = [0, 128], sizes = [8, 64], strides = [1, 1]} : vector<8x256xf32> to vector<8x64xf32>
    %201 = math.tanh %200 : vector<8x64xf32>
    %202 = vector.extract_strided_slice %187 {offsets = [0, 192], sizes = [8, 64], strides = [1, 1]} : vector<8x256xf32> to vector<8x64xf32>
    %203 = arith.negf %202 : vector<8x64xf32>
    %204 = math.exp %203 : vector<8x64xf32>
    %cst_62 = arith.constant 1.000000e+00 : f32
    %205 = vector.broadcast %cst_62 : f32 to vector<8x64xf32>
    %206 = arith.addf %205, %204 : vector<8x64xf32>
    %207 = arith.divf %205, %206 : vector<8x64xf32>
    %208 = arith.mulf %199, %156 : vector<8x64xf32>
    %209 = arith.mulf %193, %201 : vector<8x64xf32>
    %210 = arith.addf %208, %209 : vector<8x64xf32>
    %211 = math.tanh %210 : vector<8x64xf32>
    %212 = arith.mulf %207, %211 : vector<8x64xf32>
    %213 = vector.broadcast %13 : vector<1x64xf32> to vector<8x64xf32>
    %214 = arith.mulf %212, %213 : vector<8x64xf32>
    %cst_63 = arith.constant dense<0.000000e+00> : vector<8xf32>
    %215 = vector.multi_reduction <add>, %214, %cst_63 [1] : vector<8x64xf32> to vector<8xf32>
    %216 = vector.shape_cast %215 : vector<8xf32> to vector<8x1xf32>
    %217 = arith.truncf %212 : vector<8x64xf32> to vector<8x64xbf16>
    %cst_64 = arith.constant dense<0.000000e+00> : vector<8x32xf32>
    %218 = tpu.matmul %217, %14, %cst_64 {dimension_numbers = #tpu.dot_dimension_numbers<[1], [0], [0], [1], [0, 0, 1, 1], [], []>} : vector<8x64xbf16>, vector<64x32xbf16>, vector<8x32xf32> -> vector<8x32xf32>
    %219 = math.tanh %218 : vector<8x32xf32>
    %220 = arith.index_cast %c3_i32 : i32 to index
    %c0_65 = arith.constant 0 : index
    %c0_66 = arith.constant 0 : index
    %221 = vector.load %arg3[%220, %c0_65, %c0_66] : memref<8x8x32xf32, #tpu.memory_space<vmem>>, vector<1x8x32xf32>
    %222 = vector.shape_cast %221 : vector<1x8x32xf32> to vector<8x32xf32>
    %223 = arith.mulf %222, %219 : vector<8x32xf32>
    %224 = arith.maximumf %170, %216 : vector<8x1xf32>
    %225 = arith.subf %170, %224 : vector<8x1xf32>
    %226 = math.exp %225 : vector<8x1xf32>
    %227 = arith.subf %216, %224 : vector<8x1xf32>
    %228 = math.exp %227 : vector<8x1xf32>
    %229 = arith.mulf %226, %176 : vector<8x1xf32>
    %230 = arith.addf %229, %228 : vector<8x1xf32>
    %231 = vector.broadcast %226 : vector<8x1xf32> to vector<8x32xf32>
    %232 = arith.mulf %231, %181 : vector<8x32xf32>
    %233 = vector.broadcast %228 : vector<8x1xf32> to vector<8x32xf32>
    %234 = arith.mulf %233, %223 : vector<8x32xf32>
    %235 = arith.addf %232, %234 : vector<8x32xf32>
    %c4_i32 = arith.constant 4 : i32
    %236 = arith.index_cast %c4_i32 : i32 to index
    %c0_67 = arith.constant 0 : index
    %c0_68 = arith.constant 0 : index
    %237 = vector.load %arg12[%236, %c0_67, %c0_68] : memref<8x8x256xf32, #tpu.memory_space<vmem>>, vector<1x8x256xf32>
    %238 = vector.shape_cast %237 : vector<1x8x256xf32> to vector<8x256xf32>
    %239 = arith.truncf %212 : vector<8x64xf32> to vector<8x64xbf16>
    %cst_69 = arith.constant dense<0.000000e+00> : vector<8x256xf32>
    %240 = tpu.matmul %239, %12, %cst_69 {dimension_numbers = #tpu.dot_dimension_numbers<[1], [0], [0], [1], [0, 0, 1, 1], [], []>} : vector<8x64xbf16>, vector<64x256xbf16>, vector<8x256xf32> -> vector<8x256xf32>
    %241 = arith.addf %238, %240 : vector<8x256xf32>
    %242 = vector.extract_strided_slice %241 {offsets = [0, 0], sizes = [8, 64], strides = [1, 1]} : vector<8x256xf32> to vector<8x64xf32>
    %243 = arith.negf %242 : vector<8x64xf32>
    %244 = math.exp %243 : vector<8x64xf32>
    %cst_70 = arith.constant 1.000000e+00 : f32
    %245 = vector.broadcast %cst_70 : f32 to vector<8x64xf32>
    %246 = arith.addf %245, %244 : vector<8x64xf32>
    %247 = arith.divf %245, %246 : vector<8x64xf32>
    %248 = vector.extract_strided_slice %241 {offsets = [0, 64], sizes = [8, 64], strides = [1, 1]} : vector<8x256xf32> to vector<8x64xf32>
    %249 = arith.negf %248 : vector<8x64xf32>
    %250 = math.exp %249 : vector<8x64xf32>
    %cst_71 = arith.constant 1.000000e+00 : f32
    %251 = vector.broadcast %cst_71 : f32 to vector<8x64xf32>
    %252 = arith.addf %251, %250 : vector<8x64xf32>
    %253 = arith.divf %251, %252 : vector<8x64xf32>
    %254 = vector.extract_strided_slice %241 {offsets = [0, 128], sizes = [8, 64], strides = [1, 1]} : vector<8x256xf32> to vector<8x64xf32>
    %255 = math.tanh %254 : vector<8x64xf32>
    %256 = vector.extract_strided_slice %241 {offsets = [0, 192], sizes = [8, 64], strides = [1, 1]} : vector<8x256xf32> to vector<8x64xf32>
    %257 = arith.negf %256 : vector<8x64xf32>
    %258 = math.exp %257 : vector<8x64xf32>
    %cst_72 = arith.constant 1.000000e+00 : f32
    %259 = vector.broadcast %cst_72 : f32 to vector<8x64xf32>
    %260 = arith.addf %259, %258 : vector<8x64xf32>
    %261 = arith.divf %259, %260 : vector<8x64xf32>
    %262 = arith.mulf %253, %210 : vector<8x64xf32>
    %263 = arith.mulf %247, %255 : vector<8x64xf32>
    %264 = arith.addf %262, %263 : vector<8x64xf32>
    %265 = math.tanh %264 : vector<8x64xf32>
    %266 = arith.mulf %261, %265 : vector<8x64xf32>
    %267 = vector.broadcast %13 : vector<1x64xf32> to vector<8x64xf32>
    %268 = arith.mulf %266, %267 : vector<8x64xf32>
    %cst_73 = arith.constant dense<0.000000e+00> : vector<8xf32>
    %269 = vector.multi_reduction <add>, %268, %cst_73 [1] : vector<8x64xf32> to vector<8xf32>
    %270 = vector.shape_cast %269 : vector<8xf32> to vector<8x1xf32>
    %271 = arith.truncf %266 : vector<8x64xf32> to vector<8x64xbf16>
    %cst_74 = arith.constant dense<0.000000e+00> : vector<8x32xf32>
    %272 = tpu.matmul %271, %14, %cst_74 {dimension_numbers = #tpu.dot_dimension_numbers<[1], [0], [0], [1], [0, 0, 1, 1], [], []>} : vector<8x64xbf16>, vector<64x32xbf16>, vector<8x32xf32> -> vector<8x32xf32>
    %273 = math.tanh %272 : vector<8x32xf32>
    %274 = arith.index_cast %c4_i32 : i32 to index
    %c0_75 = arith.constant 0 : index
    %c0_76 = arith.constant 0 : index
    %275 = vector.load %arg3[%274, %c0_75, %c0_76] : memref<8x8x32xf32, #tpu.memory_space<vmem>>, vector<1x8x32xf32>
    %276 = vector.shape_cast %275 : vector<1x8x32xf32> to vector<8x32xf32>
    %277 = arith.mulf %276, %273 : vector<8x32xf32>
    %278 = arith.maximumf %224, %270 : vector<8x1xf32>
    %279 = arith.subf %224, %278 : vector<8x1xf32>
    %280 = math.exp %279 : vector<8x1xf32>
    %281 = arith.subf %270, %278 : vector<8x1xf32>
    %282 = math.exp %281 : vector<8x1xf32>
    %283 = arith.mulf %280, %230 : vector<8x1xf32>
    %284 = arith.addf %283, %282 : vector<8x1xf32>
    %285 = vector.broadcast %280 : vector<8x1xf32> to vector<8x32xf32>
    %286 = arith.mulf %285, %235 : vector<8x32xf32>
    %287 = vector.broadcast %282 : vector<8x1xf32> to vector<8x32xf32>
    %288 = arith.mulf %287, %277 : vector<8x32xf32>
    %289 = arith.addf %286, %288 : vector<8x32xf32>
    %c5_i32 = arith.constant 5 : i32
    %290 = arith.index_cast %c5_i32 : i32 to index
    %c0_77 = arith.constant 0 : index
    %c0_78 = arith.constant 0 : index
    %291 = vector.load %arg12[%290, %c0_77, %c0_78] : memref<8x8x256xf32, #tpu.memory_space<vmem>>, vector<1x8x256xf32>
    %292 = vector.shape_cast %291 : vector<1x8x256xf32> to vector<8x256xf32>
    %293 = arith.truncf %266 : vector<8x64xf32> to vector<8x64xbf16>
    %cst_79 = arith.constant dense<0.000000e+00> : vector<8x256xf32>
    %294 = tpu.matmul %293, %12, %cst_79 {dimension_numbers = #tpu.dot_dimension_numbers<[1], [0], [0], [1], [0, 0, 1, 1], [], []>} : vector<8x64xbf16>, vector<64x256xbf16>, vector<8x256xf32> -> vector<8x256xf32>
    %295 = arith.addf %292, %294 : vector<8x256xf32>
    %296 = vector.extract_strided_slice %295 {offsets = [0, 0], sizes = [8, 64], strides = [1, 1]} : vector<8x256xf32> to vector<8x64xf32>
    %297 = arith.negf %296 : vector<8x64xf32>
    %298 = math.exp %297 : vector<8x64xf32>
    %cst_80 = arith.constant 1.000000e+00 : f32
    %299 = vector.broadcast %cst_80 : f32 to vector<8x64xf32>
    %300 = arith.addf %299, %298 : vector<8x64xf32>
    %301 = arith.divf %299, %300 : vector<8x64xf32>
    %302 = vector.extract_strided_slice %295 {offsets = [0, 64], sizes = [8, 64], strides = [1, 1]} : vector<8x256xf32> to vector<8x64xf32>
    %303 = arith.negf %302 : vector<8x64xf32>
    %304 = math.exp %303 : vector<8x64xf32>
    %cst_81 = arith.constant 1.000000e+00 : f32
    %305 = vector.broadcast %cst_81 : f32 to vector<8x64xf32>
    %306 = arith.addf %305, %304 : vector<8x64xf32>
    %307 = arith.divf %305, %306 : vector<8x64xf32>
    %308 = vector.extract_strided_slice %295 {offsets = [0, 128], sizes = [8, 64], strides = [1, 1]} : vector<8x256xf32> to vector<8x64xf32>
    %309 = math.tanh %308 : vector<8x64xf32>
    %310 = vector.extract_strided_slice %295 {offsets = [0, 192], sizes = [8, 64], strides = [1, 1]} : vector<8x256xf32> to vector<8x64xf32>
    %311 = arith.negf %310 : vector<8x64xf32>
    %312 = math.exp %311 : vector<8x64xf32>
    %cst_82 = arith.constant 1.000000e+00 : f32
    %313 = vector.broadcast %cst_82 : f32 to vector<8x64xf32>
    %314 = arith.addf %313, %312 : vector<8x64xf32>
    %315 = arith.divf %313, %314 : vector<8x64xf32>
    %316 = arith.mulf %307, %264 : vector<8x64xf32>
    %317 = arith.mulf %301, %309 : vector<8x64xf32>
    %318 = arith.addf %316, %317 : vector<8x64xf32>
    %319 = math.tanh %318 : vector<8x64xf32>
    %320 = arith.mulf %315, %319 : vector<8x64xf32>
    %321 = vector.broadcast %13 : vector<1x64xf32> to vector<8x64xf32>
    %322 = arith.mulf %320, %321 : vector<8x64xf32>
    %cst_83 = arith.constant dense<0.000000e+00> : vector<8xf32>
    %323 = vector.multi_reduction <add>, %322, %cst_83 [1] : vector<8x64xf32> to vector<8xf32>
    %324 = vector.shape_cast %323 : vector<8xf32> to vector<8x1xf32>
    %325 = arith.truncf %320 : vector<8x64xf32> to vector<8x64xbf16>
    %cst_84 = arith.constant dense<0.000000e+00> : vector<8x32xf32>
    %326 = tpu.matmul %325, %14, %cst_84 {dimension_numbers = #tpu.dot_dimension_numbers<[1], [0], [0], [1], [0, 0, 1, 1], [], []>} : vector<8x64xbf16>, vector<64x32xbf16>, vector<8x32xf32> -> vector<8x32xf32>
    %327 = math.tanh %326 : vector<8x32xf32>
    %328 = arith.index_cast %c5_i32 : i32 to index
    %c0_85 = arith.constant 0 : index
    %c0_86 = arith.constant 0 : index
    %329 = vector.load %arg3[%328, %c0_85, %c0_86] : memref<8x8x32xf32, #tpu.memory_space<vmem>>, vector<1x8x32xf32>
    %330 = vector.shape_cast %329 : vector<1x8x32xf32> to vector<8x32xf32>
    %331 = arith.mulf %330, %327 : vector<8x32xf32>
    %332 = arith.maximumf %278, %324 : vector<8x1xf32>
    %333 = arith.subf %278, %332 : vector<8x1xf32>
    %334 = math.exp %333 : vector<8x1xf32>
    %335 = arith.subf %324, %332 : vector<8x1xf32>
    %336 = math.exp %335 : vector<8x1xf32>
    %337 = arith.mulf %334, %284 : vector<8x1xf32>
    %338 = arith.addf %337, %336 : vector<8x1xf32>
    %339 = vector.broadcast %334 : vector<8x1xf32> to vector<8x32xf32>
    %340 = arith.mulf %339, %289 : vector<8x32xf32>
    %341 = vector.broadcast %336 : vector<8x1xf32> to vector<8x32xf32>
    %342 = arith.mulf %341, %331 : vector<8x32xf32>
    %343 = arith.addf %340, %342 : vector<8x32xf32>
    %c6_i32 = arith.constant 6 : i32
    %344 = arith.index_cast %c6_i32 : i32 to index
    %c0_87 = arith.constant 0 : index
    %c0_88 = arith.constant 0 : index
    %345 = vector.load %arg12[%344, %c0_87, %c0_88] : memref<8x8x256xf32, #tpu.memory_space<vmem>>, vector<1x8x256xf32>
    %346 = vector.shape_cast %345 : vector<1x8x256xf32> to vector<8x256xf32>
    %347 = arith.truncf %320 : vector<8x64xf32> to vector<8x64xbf16>
    %cst_89 = arith.constant dense<0.000000e+00> : vector<8x256xf32>
    %348 = tpu.matmul %347, %12, %cst_89 {dimension_numbers = #tpu.dot_dimension_numbers<[1], [0], [0], [1], [0, 0, 1, 1], [], []>} : vector<8x64xbf16>, vector<64x256xbf16>, vector<8x256xf32> -> vector<8x256xf32>
    %349 = arith.addf %346, %348 : vector<8x256xf32>
    %350 = vector.extract_strided_slice %349 {offsets = [0, 0], sizes = [8, 64], strides = [1, 1]} : vector<8x256xf32> to vector<8x64xf32>
    %351 = arith.negf %350 : vector<8x64xf32>
    %352 = math.exp %351 : vector<8x64xf32>
    %cst_90 = arith.constant 1.000000e+00 : f32
    %353 = vector.broadcast %cst_90 : f32 to vector<8x64xf32>
    %354 = arith.addf %353, %352 : vector<8x64xf32>
    %355 = arith.divf %353, %354 : vector<8x64xf32>
    %356 = vector.extract_strided_slice %349 {offsets = [0, 64], sizes = [8, 64], strides = [1, 1]} : vector<8x256xf32> to vector<8x64xf32>
    %357 = arith.negf %356 : vector<8x64xf32>
    %358 = math.exp %357 : vector<8x64xf32>
    %cst_91 = arith.constant 1.000000e+00 : f32
    %359 = vector.broadcast %cst_91 : f32 to vector<8x64xf32>
    %360 = arith.addf %359, %358 : vector<8x64xf32>
    %361 = arith.divf %359, %360 : vector<8x64xf32>
    %362 = vector.extract_strided_slice %349 {offsets = [0, 128], sizes = [8, 64], strides = [1, 1]} : vector<8x256xf32> to vector<8x64xf32>
    %363 = math.tanh %362 : vector<8x64xf32>
    %364 = vector.extract_strided_slice %349 {offsets = [0, 192], sizes = [8, 64], strides = [1, 1]} : vector<8x256xf32> to vector<8x64xf32>
    %365 = arith.negf %364 : vector<8x64xf32>
    %366 = math.exp %365 : vector<8x64xf32>
    %cst_92 = arith.constant 1.000000e+00 : f32
    %367 = vector.broadcast %cst_92 : f32 to vector<8x64xf32>
    %368 = arith.addf %367, %366 : vector<8x64xf32>
    %369 = arith.divf %367, %368 : vector<8x64xf32>
    %370 = arith.mulf %361, %318 : vector<8x64xf32>
    %371 = arith.mulf %355, %363 : vector<8x64xf32>
    %372 = arith.addf %370, %371 : vector<8x64xf32>
    %373 = math.tanh %372 : vector<8x64xf32>
    %374 = arith.mulf %369, %373 : vector<8x64xf32>
    %375 = vector.broadcast %13 : vector<1x64xf32> to vector<8x64xf32>
    %376 = arith.mulf %374, %375 : vector<8x64xf32>
    %cst_93 = arith.constant dense<0.000000e+00> : vector<8xf32>
    %377 = vector.multi_reduction <add>, %376, %cst_93 [1] : vector<8x64xf32> to vector<8xf32>
    %378 = vector.shape_cast %377 : vector<8xf32> to vector<8x1xf32>
    %379 = arith.truncf %374 : vector<8x64xf32> to vector<8x64xbf16>
    %cst_94 = arith.constant dense<0.000000e+00> : vector<8x32xf32>
    %380 = tpu.matmul %379, %14, %cst_94 {dimension_numbers = #tpu.dot_dimension_numbers<[1], [0], [0], [1], [0, 0, 1, 1], [], []>} : vector<8x64xbf16>, vector<64x32xbf16>, vector<8x32xf32> -> vector<8x32xf32>
    %381 = math.tanh %380 : vector<8x32xf32>
    %382 = arith.index_cast %c6_i32 : i32 to index
    %c0_95 = arith.constant 0 : index
    %c0_96 = arith.constant 0 : index
    %383 = vector.load %arg3[%382, %c0_95, %c0_96] : memref<8x8x32xf32, #tpu.memory_space<vmem>>, vector<1x8x32xf32>
    %384 = vector.shape_cast %383 : vector<1x8x32xf32> to vector<8x32xf32>
    %385 = arith.mulf %384, %381 : vector<8x32xf32>
    %386 = arith.maximumf %332, %378 : vector<8x1xf32>
    %387 = arith.subf %332, %386 : vector<8x1xf32>
    %388 = math.exp %387 : vector<8x1xf32>
    %389 = arith.subf %378, %386 : vector<8x1xf32>
    %390 = math.exp %389 : vector<8x1xf32>
    %391 = arith.mulf %388, %338 : vector<8x1xf32>
    %392 = arith.addf %391, %390 : vector<8x1xf32>
    %393 = vector.broadcast %388 : vector<8x1xf32> to vector<8x32xf32>
    %394 = arith.mulf %393, %343 : vector<8x32xf32>
    %395 = vector.broadcast %390 : vector<8x1xf32> to vector<8x32xf32>
    %396 = arith.mulf %395, %385 : vector<8x32xf32>
    %397 = arith.addf %394, %396 : vector<8x32xf32>
    %c7_i32 = arith.constant 7 : i32
    %398 = arith.index_cast %c7_i32 : i32 to index
    %c0_97 = arith.constant 0 : index
    %c0_98 = arith.constant 0 : index
    %399 = vector.load %arg12[%398, %c0_97, %c0_98] : memref<8x8x256xf32, #tpu.memory_space<vmem>>, vector<1x8x256xf32>
    %400 = vector.shape_cast %399 : vector<1x8x256xf32> to vector<8x256xf32>
    %401 = arith.truncf %374 : vector<8x64xf32> to vector<8x64xbf16>
    %cst_99 = arith.constant dense<0.000000e+00> : vector<8x256xf32>
    %402 = tpu.matmul %401, %12, %cst_99 {dimension_numbers = #tpu.dot_dimension_numbers<[1], [0], [0], [1], [0, 0, 1, 1], [], []>} : vector<8x64xbf16>, vector<64x256xbf16>, vector<8x256xf32> -> vector<8x256xf32>
    %403 = arith.addf %400, %402 : vector<8x256xf32>
    %404 = vector.extract_strided_slice %403 {offsets = [0, 0], sizes = [8, 64], strides = [1, 1]} : vector<8x256xf32> to vector<8x64xf32>
    %405 = arith.negf %404 : vector<8x64xf32>
    %406 = math.exp %405 : vector<8x64xf32>
    %cst_100 = arith.constant 1.000000e+00 : f32
    %407 = vector.broadcast %cst_100 : f32 to vector<8x64xf32>
    %408 = arith.addf %407, %406 : vector<8x64xf32>
    %409 = arith.divf %407, %408 : vector<8x64xf32>
    %410 = vector.extract_strided_slice %403 {offsets = [0, 64], sizes = [8, 64], strides = [1, 1]} : vector<8x256xf32> to vector<8x64xf32>
    %411 = arith.negf %410 : vector<8x64xf32>
    %412 = math.exp %411 : vector<8x64xf32>
    %cst_101 = arith.constant 1.000000e+00 : f32
    %413 = vector.broadcast %cst_101 : f32 to vector<8x64xf32>
    %414 = arith.addf %413, %412 : vector<8x64xf32>
    %415 = arith.divf %413, %414 : vector<8x64xf32>
    %416 = vector.extract_strided_slice %403 {offsets = [0, 128], sizes = [8, 64], strides = [1, 1]} : vector<8x256xf32> to vector<8x64xf32>
    %417 = math.tanh %416 : vector<8x64xf32>
    %418 = vector.extract_strided_slice %403 {offsets = [0, 192], sizes = [8, 64], strides = [1, 1]} : vector<8x256xf32> to vector<8x64xf32>
    %419 = arith.negf %418 : vector<8x64xf32>
    %420 = math.exp %419 : vector<8x64xf32>
    %cst_102 = arith.constant 1.000000e+00 : f32
    %421 = vector.broadcast %cst_102 : f32 to vector<8x64xf32>
    %422 = arith.addf %421, %420 : vector<8x64xf32>
    %423 = arith.divf %421, %422 : vector<8x64xf32>
    %424 = arith.mulf %415, %372 : vector<8x64xf32>
    %425 = arith.mulf %409, %417 : vector<8x64xf32>
    %426 = arith.addf %424, %425 : vector<8x64xf32>
    %427 = math.tanh %426 : vector<8x64xf32>
    %428 = arith.mulf %423, %427 : vector<8x64xf32>
    %429 = vector.broadcast %13 : vector<1x64xf32> to vector<8x64xf32>
    %430 = arith.mulf %428, %429 : vector<8x64xf32>
    %cst_103 = arith.constant dense<0.000000e+00> : vector<8xf32>
    %431 = vector.multi_reduction <add>, %430, %cst_103 [1] : vector<8x64xf32> to vector<8xf32>
    %432 = vector.shape_cast %431 : vector<8xf32> to vector<8x1xf32>
    %433 = arith.truncf %428 : vector<8x64xf32> to vector<8x64xbf16>
    %cst_104 = arith.constant dense<0.000000e+00> : vector<8x32xf32>
    %434 = tpu.matmul %433, %14, %cst_104 {dimension_numbers = #tpu.dot_dimension_numbers<[1], [0], [0], [1], [0, 0, 1, 1], [], []>} : vector<8x64xbf16>, vector<64x32xbf16>, vector<8x32xf32> -> vector<8x32xf32>
    %435 = math.tanh %434 : vector<8x32xf32>
    %436 = arith.index_cast %c7_i32 : i32 to index
    %c0_105 = arith.constant 0 : index
    %c0_106 = arith.constant 0 : index
    %437 = vector.load %arg3[%436, %c0_105, %c0_106] : memref<8x8x32xf32, #tpu.memory_space<vmem>>, vector<1x8x32xf32>
    %438 = vector.shape_cast %437 : vector<1x8x32xf32> to vector<8x32xf32>
    %439 = arith.mulf %438, %435 : vector<8x32xf32>
    %440 = arith.maximumf %386, %432 : vector<8x1xf32>
    %441 = arith.subf %386, %440 : vector<8x1xf32>
    %442 = math.exp %441 : vector<8x1xf32>
    %443 = arith.subf %432, %440 : vector<8x1xf32>
    %444 = math.exp %443 : vector<8x1xf32>
    %445 = arith.mulf %442, %392 : vector<8x1xf32>
    %446 = arith.addf %445, %444 : vector<8x1xf32>
    %447 = vector.broadcast %442 : vector<8x1xf32> to vector<8x32xf32>
    %448 = arith.mulf %447, %397 : vector<8x32xf32>
    %449 = vector.broadcast %444 : vector<8x1xf32> to vector<8x32xf32>
    %450 = arith.mulf %449, %439 : vector<8x32xf32>
    %451 = arith.addf %448, %450 : vector<8x32xf32>
    %c8_i32 = arith.constant 8 : i32
    %c0_107 = arith.constant 0 : index
    %c0_108 = arith.constant 0 : index
    %452 = vector.load %arg13[%c0_107, %c0_108] : memref<8x64xf32, #tpu.memory_space<vmem>>, vector<8x64xf32>
    tpu.vector_store %arg13[%c0_107, %c0_108], %428 {strides = array<i32>} : memref<8x64xf32, #tpu.memory_space<vmem>>, vector<8x64xf32>,
    %c0_109 = arith.constant 0 : index
    %c0_110 = arith.constant 0 : index
    %453 = vector.load %arg14[%c0_109, %c0_110] : memref<8x64xf32, #tpu.memory_space<vmem>>, vector<8x64xf32>
    tpu.vector_store %arg14[%c0_109, %c0_110], %426 {strides = array<i32>} : memref<8x64xf32, #tpu.memory_space<vmem>>, vector<8x64xf32>,
    %c0_111 = arith.constant 0 : index
    %c0_112 = arith.constant 0 : index
    %454 = vector.load %arg15[%c0_111, %c0_112] : memref<8x1xf32, #tpu.memory_space<vmem>>, vector<8x1xf32>
    tpu.vector_store %arg15[%c0_111, %c0_112], %440 {strides = array<i32>} : memref<8x1xf32, #tpu.memory_space<vmem>>, vector<8x1xf32>,
    %c0_113 = arith.constant 0 : index
    %c0_114 = arith.constant 0 : index
    %455 = vector.load %arg16[%c0_113, %c0_114] : memref<8x1xf32, #tpu.memory_space<vmem>>, vector<8x1xf32>
    tpu.vector_store %arg16[%c0_113, %c0_114], %446 {strides = array<i32>} : memref<8x1xf32, #tpu.memory_space<vmem>>, vector<8x1xf32>,
    %c0_115 = arith.constant 0 : index
    %c0_116 = arith.constant 0 : index
    %456 = vector.load %arg17[%c0_115, %c0_116] : memref<8x32xf32, #tpu.memory_space<vmem>>, vector<8x32xf32>
    tpu.vector_store %arg17[%c0_115, %c0_116], %451 {strides = array<i32>} : memref<8x32xf32, #tpu.memory_space<vmem>>, vector<8x32xf32>,
    %c0_i32_117 = arith.constant 0 : i32
    %457 = arith.cmpi eq, %arg1, %c0_i32_117 : i32
    %458 = arith.extui %457 : i1 to i32
    %c0_i32_118 = arith.constant 0 : i32
    %459 = arith.cmpi ne, %458, %c0_i32_118 : i32
    scf.if %459 {
      %460 = tpu.reciprocal %446 {approx = true} : vector<8x1xf32> -> vector<8x1xf32>
      %461 = vector.broadcast %460 : vector<8x1xf32> to vector<8x32xf32>
      %462 = arith.mulf %451, %461 : vector<8x32xf32>
      %c0_119 = arith.constant 0 : index
      %c0_120 = arith.constant 0 : index
      %463 = vector.load %arg9[%c0_119, %c0_120] : memref<32x128xf32, #tpu.memory_space<vmem>>, vector<32x128xf32>
      %cst_121 = arith.constant dense<0.000000e+00> : vector<8x128xf32>
      %464 = tpu.matmul %462, %463, %cst_121 {dimension_numbers = #tpu.dot_dimension_numbers<[1], [0], [0], [1], [0, 0, 1, 1], [], []>} : vector<8x32xf32>, vector<32x128xf32>, vector<8x128xf32> -> vector<8x128xf32>
      %c0_122 = arith.constant 0 : index
      %c0_123 = arith.constant 0 : index
      %465 = vector.load %arg10[%c0_122, %c0_123] : memref<1x128xf32, #tpu.memory_space<vmem>>, vector<1x128xf32>
      %466 = vector.broadcast %465 : vector<1x128xf32> to vector<8x128xf32>
      %467 = arith.addf %464, %466 : vector<8x128xf32>
      %c0_124 = arith.constant 0 : index
      %c0_125 = arith.constant 0 : index
      %468 = vector.load %arg11[%c0_124, %c0_125] : memref<8x128xf32, #tpu.memory_space<vmem>>, vector<8x128xf32>
      tpu.vector_store %arg11[%c0_124, %c0_125], %467 {strides = array<i32>} : memref<8x128xf32, #tpu.memory_space<vmem>>, vector<8x128xf32>,
    } else {
    }
    return
  }
  func.func @transform_0(%arg0: i32, %arg1: i32) -> (i32, i32, i32) {
    %c0_i32 = arith.constant 0 : i32
    %c0_i32_0 = arith.constant 0 : i32
    return %arg1, %arg0, %c0_i32 : i32, i32, i32
  }
  func.func @transform_1(%arg0: i32, %arg1: i32) -> (i32, i32, i32) {
    %c0_i32 = arith.constant 0 : i32
    %c0_i32_0 = arith.constant 0 : i32
    return %arg1, %arg0, %c0_i32 : i32, i32, i32
  }
  func.func @transform_2(%arg0: i32, %arg1: i32) -> (i32, i32) {
    %c0_i32 = arith.constant 0 : i32
    %c0_i32_0 = arith.constant 0 : i32
    %c0_i32_1 = arith.constant 0 : i32
    return %c0_i32, %c0_i32_0 : i32, i32
  }
  func.func @transform_3(%arg0: i32, %arg1: i32) -> (i32, i32) {
    %c0_i32 = arith.constant 0 : i32
    %c0_i32_0 = arith.constant 0 : i32
    %c0_i32_1 = arith.constant 0 : i32
    return %c0_i32, %c0_i32_0 : i32, i32
  }
  func.func @transform_4(%arg0: i32, %arg1: i32) -> (i32, i32) {
    %c0_i32 = arith.constant 0 : i32
    %c0_i32_0 = arith.constant 0 : i32
    %c0_i32_1 = arith.constant 0 : i32
    return %c0_i32, %c0_i32_0 : i32, i32
  }
  func.func @transform_5(%arg0: i32, %arg1: i32) -> (i32, i32) {
    %c0_i32 = arith.constant 0 : i32
    %c0_i32_0 = arith.constant 0 : i32
    %c0_i32_1 = arith.constant 0 : i32
    return %c0_i32, %c0_i32_0 : i32, i32
  }
  func.func @transform_6(%arg0: i32, %arg1: i32) -> (i32, i32) {
    %c0_i32 = arith.constant 0 : i32
    %c0_i32_0 = arith.constant 0 : i32
    %c0_i32_1 = arith.constant 0 : i32
    return %c0_i32, %c0_i32_0 : i32, i32
  }
  func.func @transform_7(%arg0: i32, %arg1: i32) -> (i32, i32) {
    %c0_i32 = arith.constant 0 : i32
    %c0_i32_0 = arith.constant 0 : i32
    %c0_i32_1 = arith.constant 0 : i32
    return %c0_i32, %c0_i32_0 : i32, i32
  }
  func.func @transform_8(%arg0: i32, %arg1: i32) -> (i32, i32) {
    %c0_i32 = arith.constant 0 : i32
    %c0_i32_0 = arith.constant 0 : i32
    %c0_i32_1 = arith.constant 0 : i32
    return %c0_i32, %c0_i32_0 : i32, i32
  }
  func.func @transform_9(%arg0: i32, %arg1: i32) -> (i32, i32) {
    %c0_i32 = arith.constant 0 : i32
    %c0_i32_0 = arith.constant 0 : i32
    return %arg0, %c0_i32 : i32, i32
  }
}

</mosaic_0001>

<bundles_post_ra>
// kernel: tpu_custom_call.1
= control target key start
LH: loop header
LB: loop body
LE: loop exit
PB: predicated region body
PF: predicated region fallthrough
CT: control target
= control target key end

     0   :  { %14 = vsyncpa [#allocation9], 0  ;;  %s2388_s0 = inlined_call_operand.hbm [shape: f32[8,8,35], index: 0, kind: input, shape index: {}]   ;;  %s2389_s1 = inlined_call_operand.hbm [shape: f32[8,8,32], index: 1, kind: input, shape index: {}]   ;;  %s2390_s2 = inlined_call_operand.hbm [shape: f32[35,256], index: 2, kind: input, shape index: {}]   ;;  %s2391_s3 = inlined_call_operand.vmem [shape: f32[1,256], index: 3, kind: input, shape index: {}]   ;;  %s2392_s4 = inlined_call_operand.hbm [shape: bf16[64,256], index: 4, kind: input, shape index: {}]   ;;  %s2393_s5 = inlined_call_operand.vmem [shape: f32[1,64], index: 5, kind: input, shape index: {}]   ;;  %s2394_s6 = inlined_call_operand.vmem [shape: bf16[64,32], index: 6, kind: input, shape index: {}]   ;;  %s2395_s7 = inlined_call_operand.vmem [shape: f32[32,128], index: 7, kind: input, shape index: {}]   ;;  %s2396_s8 = inlined_call_operand.vmem [shape: f32[1,128], index: 8, kind: input, shape index: {}]   ;;  %s2397_s9 = inlined_call_operand.hbm [shape: f32[8,128], index: 9, kind: output, shape index: {}]  }
   0x1   :  { %15 = vsyncpa [#allocation12], 0 }
   0x2   :  { %16 = vsyncpa [#allocation15], 0 }
   0x3   :  { %17 = vsyncpa [#allocation10], 0  ;;  %s35_s11 = sshll.u32 %s2389_s1, 4  ;;  %s1912_s12 = smov [#allocation11]   ;;  %s36_s11 = int_to_ptr.hbm [resolvable:$true] %s35_s11 }
   0x4   :  { %s37_s13 = sshll.u32 %s1912_s12, 4  ;;  %s22_s16 = sshll.u32 %s2388_s0, 4  ;;  %s38_s13 = int_to_ptr.vmem [resolvable:$true] %s37_s13  ;;  %s23_s16 = int_to_ptr.hbm [resolvable:$true] %s22_s16 }
   0x5   :  { %s1913_s17 = smov 128   ;;  %s1914_s18 = smov 8  }
   0x6   :  { %43 = dma.hbm_to_vmem [thread:$0]  %s36_s11, 1024, %s38_s13, [#allocation12], %s1913_s17, %s1913_s17, %s1914_s18  }
   0x7   :  { %s1915_s19 = smov [#allocation8]   ;;  %s48_s23 = sshll.u32 %s2390_s2, 4  ;;  %s49_s23 = int_to_ptr.hbm [resolvable:$true] %s48_s23 }
   0x8   :  { %s24_s20 = sshll.u32 %s1915_s19, 4  ;;  %s1916_s1 = smov [#allocation13]   ;;  %s25_s20 = int_to_ptr.vmem [resolvable:$true] %s24_s20 }
   0x9   :  { %30 = dma.hbm_to_vmem [thread:$0]  %s23_s16, 1024, %s25_s20, [#allocation9], %s1913_s17, %s1913_s17, %s1914_s18  }
   0xa   :  { %s50_s24 = sshll.u32 %s1916_s1, 4  ;;  %s63_s0 = sshll.u32 %s2392_s4, 4  ;;  %s51_s24 = int_to_ptr.vmem [resolvable:$true] %s50_s24  ;;  %s64_s0 = int_to_ptr.hbm [resolvable:$true] %s63_s0 }
   0xb   :  { %s1917_s27 = smov 256   ;;  %s1918_s28 = smov 16  }
   0xc   :  { %56 = dma.hbm_to_vmem [thread:$0]  %s49_s23, 1280, %s51_s24, [#allocation12], %s1917_s27, %s1917_s27, %s1918_s28  }
   0xd   :  { %s1919_s29 = smov [#allocation14]  }
   0xe   :  { %s65_s30 = sshll.u32 %s1919_s29, 4  ;;  %s66_s30 = int_to_ptr.vmem [resolvable:$true] %s65_s30 }
   0xf   :  { %71 = dma.hbm_to_vmem [thread:$0]  %s64_s0, 1024, %s66_s30, [#allocation15], %s1913_s17, %s1913_s17, %s1914_s18  }
  0x10   :  { %1904 = dma.done.wait [#allocation9], 1024  }
  0x11   :  { %1905 = vsyncadd [#allocation9], 4294966272 }
  0x12   :  { %1906 = dma.done.wait [#allocation12], 2304  }
  0x13   :  { %1907 = vsyncadd [#allocation12], 4294964992 }
  0x14   :  { %1908 = dma.done.wait [#allocation15], 1024  }
  0x15   :  { %1909 = vsyncadd [#allocation15], 4294966272  ;;  %vm101_vm0 = vcmask 523264   ;;  %v1920_v0 = vmov 0.0   ;;  %vm158_vm1 = vcmask 1042432   ;;  %v123_v13 = vld [vmem:[#allocation13 + $0x30] sm:$0xff] }
  0x16   :  { %102 = vst.msk [vmem:[#allocation3] sm:$0xff] %vm101_vm0, %v1920_v0  ;;  %v1545_v1 = vld [vmem:[#allocation14 + $0x30] sm:$0xf]  ;;  %v1615_v2 = vld [vmem:[#allocation14 + $0x34] sm:$0xf0]  ;;  %v119_v18 = vld [vmem:[#allocation13 + $0x10] sm:$0xff] }
  0x17   :  { %103 = vst.msk [vmem:[#allocation4] sm:$0xff] %vm101_vm0, %v1920_v0  ;;  %v1537_v3 = vld [vmem:[#allocation14 + $0x20] sm:$0xf]  ;;  %v1991_v4 = vor.u32 %v1615_v2, %v1545_v1  ;;  %v1613_v5 = vld [vmem:[#allocation14 + $0x24] sm:$0xf0]  ;;  %v121_v16 = vld [vmem:[#allocation13 + $0x20] sm:$0xff] }
  0x18   :  { %v1614_v6 = vld [vmem:[#allocation14 + $0x34] sm:$0xf]  ;;  %v1547_v7 = vld [vmem:[#allocation14 + $0x38] sm:$0xf0]  ;;  %v125_v8 = vld [vmem:[#allocation13 + $0x40] sm:$0x7]  ;;  %v1994_v9 = vor.u32 %v1613_v5, %v1537_v3 }
  0x19   :  { %336 = vmatpush.bf16.msra.mxu2 %v1991_v4  ;;  %v1529_v10 = vld [vmem:[#allocation14 + $0x10] sm:$0xf]  ;;  %v1611_v11 = vld [vmem:[#allocation14 + $0x14] sm:$0xf0]  ;;  %v1996_v12 = vor.u32 %v1614_v6, %v1547_v7  ;;  %1501 = vmatpush.msk.msra.mxu0 %vm158_vm1, %v125_v8  ;;  %v1612_v14 = vld [vmem:[#allocation14 + $0x24] sm:$0xf] }
  0x1a   :  { %v1539_v15 = vld [vmem:[#allocation14 + $0x28] sm:$0xf0]  ;;  %v1610_v19 = vld [vmem:[#allocation14 + $0x14] sm:$0xf]  ;;  %v1531_v20 = vld [vmem:[#allocation14 + $0x18] sm:$0xf0]  ;;  %v2003_v22 = vor.u32 %v1611_v11, %v1529_v10 }
  0x1b   :  { %349 = vmatpush.bf16.msra.mxu3 %v1996_v12  ;;  %177 = vmatpush.msra.mxu0 %v123_v13  ;;  %v2000_v17 = vor.u32 %v1612_v14, %v1539_v15  ;;  %v126_v21 = vld [vmem:[#allocation13 + $0x48] sm:$0x7]  ;;  %v1521_v23 = vld [vmem:[#allocation14] sm:$0xf]  ;;  %v124_v24 = vld [vmem:[#allocation13 + $0x38] sm:$0xff]  ;;  %v2007_v28 = vor.u32 %v1610_v19, %v1531_v20  ;;  %vm133_vm2 = vcmask 285696  }
  0x1c   :  { %v1609_v25 = vld [vmem:[#allocation14 + $0x4] sm:$0xf0]  ;;  %v117_v26 = vld [vmem:[#allocation13] sm:$0xff]  ;;  %1510 = vmatpush.msk.msra.mxu1 %vm158_vm1, %v126_v21  ;;  %v1608_v29 = vld [vmem:[#allocation14 + $0x4] sm:$0xf]  ;;  %s1921_s2 = smov 64  }
  0x1d   :  { %337 = vmatpush.bf16.msra.mxu2 %v1994_v9  ;;  %178 = vmatpush.msra.mxu0 %v121_v16  ;;  %v109_v27 = vld [vmem:[#allocation8] sm:$0xff]  ;;  %v122_v30 = vld [vmem:[#allocation13 + $0x28] sm:$0xff]  ;;  %v1523_v32 = vld [vmem:[#allocation14 + $0x8] sm:$0xf0]  ;;  %v2011_v33 = vor.u32 %v1609_v25, %v1521_v23  ;;  %s1924_s26 = smov [#allocation16]   ;;  %s1489_s29 = sshll.u32 %s2397_s9, 4  ;;  %s1490_s29 = int_to_ptr.hbm [resolvable:$true] %s1489_s29 }
  0x1e   :  { %v281_v31 = vld [vmem:[#allocation4] sm:$0xff]  ;;  %218 = vmatpush.msra.mxu1 %v124_v24  ;;  %v280_v34 = vld [vmem:[#allocation3] sm:$0xff]  ;;  %v2015_v36 = vor.u32 %v1608_v29, %v1523_v32  ;;  %v118_v37 = vld [vmem:[#allocation13 + $0x8] sm:$0xff]  ;;  %s1487_s0 = sshll.u32 %s1924_s26, 4  ;;  %s1488_s0 = int_to_ptr.vmem [resolvable:$true] %s1487_s0 }
  0x1f   :  { %350 = vmatpush.bf16.msra.mxu3 %v2000_v17  ;;  %179 = vmatpush.msra.mxu0 %v119_v18  ;;  %v120_v35 = vld [vmem:[#allocation13 + $0x18] sm:$0xff]  ;;  %v287_v38 = vpack.c.bf16 %v280_v34, %v280_v34  ;;  %v2047_v8 = vld [vmem:[%s2394_s6 + $0x18] sm:$0xff]  ;;  %v2053_v10 = vld [vmem:[%s2394_s6 + $0x10] sm:$0xff] }
  0x20   :  { %400 = vrot.lane.b32.xlu0 %v281_v31, %s1921_s2  ;;  %219 = vmatpush.msra.mxu1 %v122_v30  ;;  %v127_v39 = vld [vmem:[%s2391_s3] sm:$0x3]  ;;  %v2061_v13 = vld [vmem:[%s2394_s6 + $0x8] sm:$0xff] }
  0x21   :  { %338 = vmatpush.bf16.msra.mxu2 %v2003_v22  ;;  %180 = vmatpush.msra.mxu0 %v117_v26  ;;  %v2037_v40 = vperm.slane %v127_v39, 0  ;;  %v2040_v51 = vperm.slane %v127_v39, 1  ;;  %v2069_v16 = vld [vmem:[%s2394_s6] sm:$0xff] }
  0x22   :  { %1502 = vmatmul.msk.f32.vlgmr.msra.gmra.mxu0 %vm133_vm2, %v109_v27  ;;  %220 = vmatpush.msra.mxu1 %v120_v35  ;;  %v110_v35 = vld [vmem:[#allocation8 + $0x8] sm:$0xff] }
  0x23   :  { %351 = vmatpush.bf16.msra.mxu3 %v2007_v28  ;;  %725 = vmatpush.bf16.msrb.mxu0 %v2047_v8 }
  0x24   :  { %221 = vmatpush.msra.mxu1 %v118_v37 }
  0x25   :  { %339 = vmatpush.bf16.msra.mxu2 %v2011_v33  ;;  %1511 = vmatmul.msk.f32.vlgmr.msra.gmra.mxu1 %vm133_vm2, %v109_v27 }
  0x26   :  { %767 = vmatpush.bf16.msrb.mxu1 %v1991_v4 }
  0x27   :  { %352 = vmatpush.bf16.msra.mxu3 %v2015_v36  ;;  %726 = vmatpush.bf16.msrb.mxu0 %v2053_v10 }
  0x28   :  { %1551 = vmatmul.msk.bf16.vlgmr.msra.gmra.mxu2 %vm101_vm0, %v287_v38 }
  0x29   :  { %460 = vmatpush.bf16.msrb.mxu2 %v2047_v8 }
  0x2a   :  { %1552 = vmatmul.msk.bf16.vlgmr.msra.gmra.mxu3 %vm101_vm0, %v287_v38  ;;  %768 = vmatpush.bf16.msrb.mxu1 %v1994_v9 }
  0x2b   :  { %501 = vmatpush.bf16.msrb.mxu3 %v1991_v4  ;;  %727 = vmatpush.bf16.msrb.mxu0 %v2061_v13 }
  0x2c   :  { %1503 = vmatmul.msk.f32.gmra.mxu0 %vm133_vm2, %v110_v35 }
  0x2d   :  { %461 = vmatpush.bf16.msrb.mxu2 %v2053_v10  ;;  %1512 = vmatmul.msk.f32.gmra.mxu1 %vm133_vm2, %v110_v35  ;;  %v111_v35 = vld [vmem:[#allocation8 + $0x10] sm:$0xff] }
  0x2e   :  { %769 = vmatpush.bf16.msrb.mxu1 %v2003_v22 }
  0x2f   :  { %502 = vmatpush.bf16.msrb.mxu3 %v1994_v9  ;;  %728 = vmatpush.bf16.msrb.mxu0 %v2069_v16 }
  0x31   :  { %462 = vmatpush.bf16.msrb.mxu2 %v2061_v13 }
  0x32   :  { %770 = vmatpush.bf16.msrb.mxu1 %v2011_v33 }
  0x33   :  { %503 = vmatpush.bf16.msrb.mxu3 %v2003_v22  ;;  %900 = vmatpush.bf16.msra.mxu0 %v1991_v4 }
  0x34   :  { %1504 = vmatmul.msk.f32.gmra.mxu0 %vm133_vm2, %v111_v35 }
  0x35   :  { %463 = vmatpush.bf16.msrb.mxu2 %v2069_v16  ;;  %1513 = vmatmul.msk.f32.gmra.mxu1 %vm133_vm2, %v111_v35  ;;  %v115_v35 = vld [vmem:[#allocation8 + $0x30] sm:$0xff] }
  0x36   :  { %913 = vmatpush.bf16.msra.mxu1 %v1996_v12 }
  0x37   :  { %504 = vmatpush.bf16.msrb.mxu3 %v2011_v33  ;;  %901 = vmatpush.bf16.msra.mxu0 %v1994_v9 }
  0x39   :  { %514 = vmatpush.bf16.msra.mxu2 %v1996_v12 }
  0x3a   :  { %914 = vmatpush.bf16.msra.mxu1 %v2000_v17 }
  0x3b   :  { %592 = vmatpush.bf16.msra.mxu3 %v2047_v8  ;;  %902 = vmatpush.bf16.msra.mxu0 %v2003_v22 }
  0x3d   :  { %515 = vmatpush.bf16.msra.mxu2 %v2000_v17 }
  0x3e   :  { %915 = vmatpush.bf16.msra.mxu1 %v2007_v28 }
  0x3f   :  { %593 = vmatpush.bf16.msra.mxu3 %v2053_v10  ;;  %903 = vmatpush.bf16.msra.mxu0 %v2011_v33 }
  0x41   :  { %516 = vmatpush.bf16.msra.mxu2 %v2007_v28 }
  0x42   :  { %916 = vmatpush.bf16.msra.mxu1 %v2015_v36 }
  0x43   :  { %594 = vmatpush.bf16.msra.mxu3 %v2061_v13 }
  0x45   :  { %517 = vmatpush.bf16.msra.mxu2 %v2015_v36 }
  0x47   :  { %595 = vmatpush.bf16.msra.mxu3 %v2069_v16 }
  0x92   :  { %v401_v15 = vpop.permute.xlu0 %400 }
  0x9f   :  { %v182_v41 = vpop.f32.mrf.mxu0 }
  0xa0   :  { %v183_v42 = vadd.f32 %v182_v41, %v2037_v40 }
  0xa2   :  { %v223_v52 = vpop.f32.mrf.mxu1 }
  0xa3   :  { %v224_v53 = vadd.f32 %v223_v52, %v2040_v51 }
  0xa9   :  { %v185_v38 = vpop.f32.mrf.mxu0 }
  0xaa   :  { %v186_v39 = vadd.f32 %v185_v38, %v2037_v40 }
  0xab   :  { %v341_v43 = vpop.f32.mrf.mxu2 }
  0xac   :  { %v358_v44 = vadd.f32 %v341_v43, %v183_v42 }
  0xad   :  { %v354_v45 = vpop.f32.mrf.mxu3 }
  0xae   :  { %v1553_v46 = vmul.f32 -1.442695, %v358_v44  ;;  %v359_v55 = vadd.f32 %v354_v45, %v224_v53 }
  0xb0   :  { %1638 = vpow2.f32 %v1553_v46  ;;  %v1554_v5 = vmul.f32 -1.442695, %v359_v55 }
  0xb1   :  { %v188_v38 = vpop.f32.mrf.mxu0 }
  0xb3   :  { %v343_v47 = vpop.f32.mrf.mxu2 }
  0xb5   :  { %v356_v48 = vpop.f32.mrf.mxu3 }
  0xb6   :  { %v1639_v49 = vpop.eup %1638 }
  0xb7   :  { %v363_v50 = vadd.f32 1.0, %v1639_v49  ;;  %v226_v49 = vpop.f32.mrf.mxu1 }
  0xb9   :  { %1640 = vrcp.f32 %v363_v50  ;;  %v375_v58 = vand.u32 2147483648, %v363_v50  ;;  %v373_v60 = vand.u32 2147483647, %v363_v50  ;;  %vm369_vm4 = vweird.f32 %v363_v50 }
  0xba   :  { %1642 = vtanh.f32 %v359_v55 }
  0xbb   :  { %v376_v63 = vor.u32 1.1754944e-38, %v375_v58  ;;  %vm374_vm6 = vcmp.eq.f32.partialorder %v373_v60, 8.507059e+37  ;;  %1644 = vpow2.f32 %v1554_v5 }
  0xbf   :  { %v1641_v54 = vpop.eup %1640 }
  0xc0   :  { %v365_v56 = vmul.f32 %v1641_v54, %v363_v50  ;;  %vm370_vm3 = vweird.f32 %v1641_v54  ;;  %v1643_v62 = vpop.eup %1642  ;;  %v227_v50 = vadd.f32 %v226_v49, %v2040_v51 }
  0xc1   :  { %vm371_vm5 = vmor %vm369_vm4, %vm370_vm3  ;;  %v1645_v6 = vpop.eup %1644 }
  0xc2   :  { %v366_v57 = vsub.f32 1.0, %v365_v56  ;;  %v383_v7 = vadd.f32 1.0, %v1645_v6 }
  0xc4   :  { %v367_v59 = vmul.f32 %v1641_v54, %v366_v57  ;;  %1646 = vrcp.f32 %v383_v7  ;;  %vm389_vm7 = vweird.f32 %v383_v7  ;;  %v395_v24 = vand.u32 2147483648, %v383_v7 }
  0xc5   :  { %v393_v26 = vand.u32 2147483647, %v383_v7 }
  0xc6   :  { %v368_v61 = vadd.f32 %v1641_v54, %v367_v59  ;;  %v396_v27 = vor.u32 1.1754944e-38, %v395_v24 }
  0xc7   :  { %vm394_vm10 = vcmp.eq.f32.partialorder %v393_v26, 8.507059e+37 }
  0xc8   :  { %v372_v1 = vsel %vm371_vm5, %v1641_v54, %v368_v61 }
  0xc9   :  { %v377_v2 = vsel %vm374_vm6, %v376_v63, %v372_v1 }
  0xca   :  { %v404_v3 = vmul.f32 %v1643_v62, %v377_v2  ;;  %v1647_v11 = vpop.eup %1646  ;;  %v403_v20 = vmul.f32 %v401_v15, %v377_v2 }
  0xcb   :  { %v385_v14 = vmul.f32 %v1647_v11, %v383_v7  ;;  %vm390_vm8 = vweird.f32 %v1647_v11 }
  0xcc   :  { %406 = vrot.lane.b32.xlu0 %v404_v3, %s1921_s2  ;;  %vm391_vm9 = vmor %vm389_vm7, %vm390_vm8 }
  0xcd   :  { %v386_v18 = vsub.f32 1.0, %v385_v14 }
  0xcf   :  { %v387_v19 = vmul.f32 %v1647_v11, %v386_v18 }
  0xd1   :  { %v388_v25 = vadd.f32 %v1647_v11, %v387_v19 }
  0xd3   :  { %v392_v29 = vsel %vm391_vm9, %v1647_v11, %v388_v25 }
  0xd4   :  { %v397_v31 = vsel %vm394_vm10, %v396_v27, %v392_v29 }
 0x13e   :  { %v407_v21 = vpop.permute.xlu0 %406 }
 0x13f   :  { %v2078_v23 = vadd.f32 %v407_v21, %v403_v20 }
 0x141   :  { %1648 = vtanh.f32 %v2078_v23 }
 0x147   :  { %v1649_v30 = vpop.eup %1648 }
 0x148   :  { %v2086_v32 = vmul.f32 %v1649_v30, %v397_v31 }
 0x14a   :  { %v425_v34 = vpack.c.bf16 %v2086_v32, %v2086_v32 }
 0x14c   :  { %427 = vrot.lane.b32.xlu1 %v425_v34, %s1921_s2 }
 0x1be   :  { %v428_v37 = vpop.permute.xlu1 %427 }
 0x1bf   :  { %1571 = vmatmul.msk.bf16.vlgmr.msrb.gmra.mxu2 %vm101_vm0, %v428_v37  ;;  %1572 = vmatmul.msk.bf16.vlgmr.msrb.gmra.mxu3 %vm101_vm0, %v428_v37 }
 0x1c0   :  { %634 = vmatpush.bf16.msrb.mxu2 %v1991_v4  ;;  %647 = vmatpush.bf16.msrb.mxu3 %v1996_v12 }
 0x1c4   :  { %635 = vmatpush.bf16.msrb.mxu2 %v1994_v9  ;;  %648 = vmatpush.bf16.msrb.mxu3 %v2000_v17 }
 0x1c8   :  { %636 = vmatpush.bf16.msrb.mxu2 %v2003_v22  ;;  %649 = vmatpush.bf16.msrb.mxu3 %v2007_v28 }
 0x1cc   :  { %637 = vmatpush.bf16.msrb.mxu2 %v2011_v33  ;;  %650 = vmatpush.bf16.msrb.mxu3 %v2015_v36 }
 0x1cf   :  { %1573 = vmatmul.msk.bf16.vlgmr.msra.gmra.mxu2 %vm101_vm0, %v428_v37 }
 0x1d0   :  { %780 = vmatpush.bf16.msra.mxu2 %v1996_v12 }
 0x1d4   :  { %781 = vmatpush.bf16.msra.mxu2 %v2000_v17 }
 0x1d8   :  { %782 = vmatpush.bf16.msra.mxu2 %v2007_v28 }
 0x1dc   :  { %783 = vmatpush.bf16.msra.mxu2 %v2015_v36 }
 0x242   :  { %v2110_v41 = vpop.f32.mrf.mxu2  ;;  %v506_v42 = vpop.f32.mrf.mxu3 }
 0x243   :  { %v523_v43 = vadd.f32 %v506_v42, %v186_v39  ;;  %v189_v39 = vadd.f32 %v188_v38, %v2037_v40 }
 0x245   :  { %v1574_v44 = vmul.f32 -1.442695, %v523_v43 }
 0x247   :  { %1650 = vpow2.f32 %v1574_v44 }
 0x24a   :  { %v467_v45 = vpop.f32.mrf.mxu2  ;;  %v508_v46 = vpop.f32.mrf.mxu3 }
 0x24d   :  { %v1651_v47 = vpop.eup %1650 }
 0x24e   :  { %v528_v48 = vadd.f32 1.0, %v1651_v47 }
 0x250   :  { %1652 = vrcp.f32 %v528_v48  ;;  %v540_v58 = vand.u32 2147483648, %v528_v48  ;;  %v538_v60 = vand.u32 2147483647, %v528_v48  ;;  %vm534_vm12 = vweird.f32 %v528_v48 }
 0x252   :  { %v519_v52 = vpop.f32.mrf.mxu2  ;;  %v541_v62 = vor.u32 1.1754944e-38, %v540_v58  ;;  %vm539_vm14 = vcmp.eq.f32.partialorder %v538_v60, 8.507059e+37 }
 0x253   :  { %v524_v54 = vadd.f32 %v519_v52, %v227_v50  ;;  %v229_v50 = vpop.f32.mrf.mxu1 }
 0x254   :  { %v230_v52 = vadd.f32 %v229_v50, %v2040_v51 }
 0x255   :  { %1654 = vtanh.f32 %v524_v54  ;;  %v1575_v5 = vmul.f32 -1.442695, %v524_v54 }
 0x256   :  { %v1653_v53 = vpop.eup %1652 }
 0x257   :  { %v530_v55 = vmul.f32 %v1653_v53, %v528_v48  ;;  %vm535_vm11 = vweird.f32 %v1653_v53  ;;  %1656 = vpow2.f32 %v1575_v5 }
 0x258   :  { %vm536_vm13 = vmor %vm534_vm12, %vm535_vm11 }
 0x259   :  { %v531_v56 = vsub.f32 1.0, %v530_v55 }
 0x25a   :  { %v521_v57 = vpop.f32.mrf.mxu2 }
 0x25b   :  { %v532_v59 = vmul.f32 %v1653_v53, %v531_v56  ;;  %v1655_v1 = vpop.eup %1654 }
 0x25d   :  { %v533_v61 = vadd.f32 %v1653_v53, %v532_v59  ;;  %v1657_v6 = vpop.eup %1656 }
 0x25e   :  { %v548_v7 = vadd.f32 1.0, %v1657_v6 }
 0x25f   :  { %v537_v63 = vsel %vm536_vm13, %v1653_v53, %v533_v61 }
 0x260   :  { %v542_v2 = vsel %vm539_vm14, %v541_v62, %v537_v63  ;;  %1658 = vrcp.f32 %v548_v7  ;;  %v560_v25 = vand.u32 2147483648, %v548_v7  ;;  %vm554_vm1 = vweird.f32 %v548_v7 }
 0x261   :  { %v565_v3 = vmul.f32 %v1655_v1, %v542_v2  ;;  %v564_v19 = vmul.f32 %v542_v2, %v2078_v23  ;;  %v558_v26 = vand.u32 2147483647, %v548_v7 }
 0x262   :  { %v561_v29 = vor.u32 1.1754944e-38, %v560_v25 }
 0x263   :  { %567 = vrot.lane.b32.xlu1 %v565_v3, %s1921_s2  ;;  %vm559_vm4 = vcmp.eq.f32.partialorder %v558_v26, 8.507059e+37 }
 0x266   :  { %v1659_v11 = vpop.eup %1658 }
 0x267   :  { %v550_v14 = vmul.f32 %v1659_v11, %v548_v7  ;;  %vm555_vm15 = vweird.f32 %v1659_v11 }
 0x268   :  { %vm556_vm3 = vmor %vm554_vm1, %vm555_vm15 }
 0x269   :  { %v551_v15 = vsub.f32 1.0, %v550_v14  ;;  %v112_v14 = vld [vmem:[#allocation8 + $0x18] sm:$0xff] }
 0x26a   :  { %1505 = vmatmul.msk.f32.gmra.mxu0 %vm133_vm2, %v112_v14  ;;  %1514 = vmatmul.msk.f32.gmra.mxu1 %vm133_vm2, %v112_v14 }
 0x26b   :  { %v552_v18 = vmul.f32 %v1659_v11, %v551_v15 }
 0x26d   :  { %v553_v24 = vadd.f32 %v1659_v11, %v552_v18  ;;  %v113_v18 = vld [vmem:[#allocation8 + $0x20] sm:$0xff] }
 0x26f   :  { %v557_v27 = vsel %vm556_vm3, %v1659_v11, %v553_v24  ;;  %v114_v24 = vld [vmem:[#allocation8 + $0x28] sm:$0xff] }
 0x270   :  { %v562_v31 = vsel %vm559_vm4, %v561_v29, %v557_v27 }
 0x272   :  { %1506 = vmatmul.msk.f32.gmra.mxu0 %vm133_vm2, %v113_v18  ;;  %1515 = vmatmul.msk.f32.gmra.mxu1 %vm133_vm2, %v113_v18 }
 0x27a   :  { %1507 = vmatmul.msk.f32.gmra.mxu0 %vm133_vm2, %v114_v24  ;;  %1516 = vmatmul.msk.f32.gmra.mxu1 %vm133_vm2, %v114_v24 }
 0x282   :  { %1508 = vmatmul.msk.f32.gmra.mxu0 %vm133_vm2, %v115_v35  ;;  %1517 = vmatmul.msk.f32.gmra.mxu1 %vm133_vm2, %v115_v35 }
 0x2d5   :  { %v568_v20 = vpop.permute.xlu1 %567 }
 0x2d6   :  { %v2115_v21 = vadd.f32 %v568_v20, %v564_v19 }
 0x2d8   :  { %1660 = vtanh.f32 %v2115_v21 }
 0x2de   :  { %v1661_v30 = vpop.eup %1660 }
 0x2df   :  { %v2118_v34 = vmul.f32 %v1661_v30, %v562_v31 }
 0x2e1   :  { %v581_v23 = vpack.c.bf16 %v2118_v34, %v2118_v34 }
 0x2e3   :  { %583 = vrot.lane.b32.xlu2 %v581_v23, %s1921_s2 }
 0x33d   :  { %v584_v37 = vpop.permute.xlu2 %583 }
 0x33e   :  { %1576 = vmatmul.msk.bf16.vlgmr.msra.gmra.mxu3 %vm101_vm0, %v584_v37  ;;  %1577 = vmatmul.msk.bf16.vlgmr.msrb.gmra.mxu2 %vm101_vm0, %v584_v37 }
 0x33f   :  { %858 = vmatpush.bf16.msra.mxu3 %v2047_v8  ;;  %991 = vmatpush.bf16.msrb.mxu2 %v2047_v8 }
 0x343   :  { %859 = vmatpush.bf16.msra.mxu3 %v2053_v10  ;;  %992 = vmatpush.bf16.msrb.mxu2 %v2053_v10 }
 0x347   :  { %860 = vmatpush.bf16.msra.mxu3 %v2061_v13  ;;  %993 = vmatpush.bf16.msrb.mxu2 %v2061_v13 }
 0x34b   :  { %861 = vmatpush.bf16.msra.mxu3 %v2069_v16  ;;  %994 = vmatpush.bf16.msrb.mxu2 %v2069_v16 }
 0x34e   :  { %1578 = vmatmul.msk.bf16.vlgmr.msrb.gmra.mxu3 %vm101_vm0, %v584_v37 }
 0x34f   :  { %1033 = vmatpush.bf16.msrb.mxu3 %v1991_v4 }
 0x353   :  { %1034 = vmatpush.bf16.msrb.mxu3 %v1994_v9 }
 0x357   :  { %1035 = vmatpush.bf16.msrb.mxu3 %v2003_v22 }
 0x35b   :  { %1036 = vmatpush.bf16.msrb.mxu3 %v2011_v33 }
 0x3c1   :  { %v2141_v42 = vpop.f32.mrf.mxu3  ;;  %v639_v43 = vpop.f32.mrf.mxu2 }
 0x3c2   :  { %v656_v44 = vadd.f32 %v639_v43, %v189_v39 }
 0x3c4   :  { %v1579_v45 = vmul.f32 -1.442695, %v656_v44 }
 0x3c6   :  { %1662 = vpow2.f32 %v1579_v45  ;;  %v116_v45 = vld [vmem:[#allocation8 + $0x38] sm:$0xff] }
 0x3c7   :  { %1509 = vmatmul.msk.f32.gmra.mxu0 %vm133_vm2, %v116_v45  ;;  %1518 = vmatmul.msk.f32.gmra.mxu1 %vm133_vm2, %v116_v45 }
 0x3c9   :  { %v599_v46 = vpop.f32.mrf.mxu3  ;;  %v641_v47 = vpop.f32.mrf.mxu2 }
 0x3ca   :  { %v191_v47 = vpop.f32.mrf.mxu0 }
 0x3cc   :  { %v1663_v48 = vpop.eup %1662 }
 0x3cd   :  { %v661_v49 = vadd.f32 1.0, %v1663_v48  ;;  %v232_v48 = vpop.f32.mrf.mxu1 }
 0x3cf   :  { %1664 = vrcp.f32 %v661_v49  ;;  %v673_v59 = vand.u32 2147483648, %v661_v49  ;;  %v671_v61 = vand.u32 2147483647, %v661_v49  ;;  %vm667_vm6 = vweird.f32 %v661_v49 }
 0x3d1   :  { %v652_v53 = vpop.f32.mrf.mxu3  ;;  %v674_v63 = vor.u32 1.1754944e-38, %v673_v59  ;;  %vm672_vm8 = vcmp.eq.f32.partialorder %v671_v61, 8.507059e+37 }
 0x3d2   :  { %v657_v55 = vadd.f32 %v652_v53, %v230_v52 }
 0x3d4   :  { %1666 = vtanh.f32 %v657_v55  ;;  %v1580_v6 = vmul.f32 -1.442695, %v657_v55 }
 0x3d5   :  { %v1665_v54 = vpop.eup %1664  ;;  %v2181_v50 = vpop.f32.mrf.mxu1 }
 0x3d6   :  { %v663_v56 = vmul.f32 %v1665_v54, %v661_v49  ;;  %vm668_vm5 = vweird.f32 %v1665_v54  ;;  %1668 = vpow2.f32 %v1580_v6  ;;  %v2179_v49 = vpop.f32.mrf.mxu0 }
 0x3d7   :  { %vm669_vm7 = vmor %vm667_vm6, %vm668_vm5 }
 0x3d8   :  { %v664_v57 = vsub.f32 1.0, %v663_v56 }
 0x3d9   :  { %v654_v58 = vpop.f32.mrf.mxu3 }
 0x3da   :  { %v665_v60 = vmul.f32 %v1665_v54, %v664_v57  ;;  %v1667_v2 = vpop.eup %1666  ;;  %v192_v58 = vadd.f32 %v191_v47, %v2037_v40 }
 0x3dc   :  { %v666_v62 = vadd.f32 %v1665_v54, %v665_v60  ;;  %v1669_v7 = vpop.eup %1668 }
 0x3dd   :  { %v681_v11 = vadd.f32 1.0, %v1669_v7  ;;  %v2185_v53 = vpop.f32.mrf.mxu1  ;;  %v233_v7 = vadd.f32 %v232_v48, %v2040_v51 }
 0x3de   :  { %v670_v1 = vsel %vm669_vm7, %v1665_v54, %v666_v62  ;;  %v2183_v52 = vpop.f32.mrf.mxu0 }
 0x3df   :  { %v675_v3 = vsel %vm672_vm8, %v674_v63, %v670_v1  ;;  %1670 = vrcp.f32 %v681_v11  ;;  %v693_v31 = vand.u32 2147483648, %v681_v11  ;;  %vm687_vm10 = vweird.f32 %v681_v11 }
 0x3e0   :  { %v698_v5 = vmul.f32 %v1667_v2, %v675_v3  ;;  %v697_v26 = vmul.f32 %v675_v3, %v2115_v21  ;;  %v691_v23 = vand.u32 2147483647, %v681_v11 }
 0x3e1   :  { %v694_v38 = vor.u32 1.1754944e-38, %v693_v31 }
 0x3e2   :  { %700 = vrot.lane.b32.xlu2 %v698_v5, %s1921_s2  ;;  %vm692_vm12 = vcmp.eq.f32.partialorder %v691_v23, 8.507059e+37 }
 0x3e5   :  { %v1671_v15 = vpop.eup %1670  ;;  %v2189_v55 = vpop.f32.mrf.mxu1 }
 0x3e6   :  { %v683_v19 = vmul.f32 %v1671_v15, %v681_v11  ;;  %vm688_vm9 = vweird.f32 %v1671_v15  ;;  %v2187_v54 = vpop.f32.mrf.mxu0 }
 0x3e7   :  { %vm689_vm11 = vmor %vm687_vm10, %vm688_vm9 }
 0x3e8   :  { %v684_v20 = vsub.f32 1.0, %v683_v19 }
 0x3ea   :  { %v685_v25 = vmul.f32 %v1671_v15, %v684_v20 }
 0x3ec   :  { %v686_v30 = vadd.f32 %v1671_v15, %v685_v25 }
 0x3ee   :  { %v690_v37 = vsel %vm689_vm11, %v1671_v15, %v686_v30 }
 0x3ef   :  { %v695_v39 = vsel %vm692_vm12, %v694_v38, %v690_v37 }
 0x43c   :  { %v701_v27 = vpop.permute.xlu2 %700 }
 0x43d   :  { %v2152_v29 = vadd.f32 %v701_v27, %v697_v26 }
 0x43f   :  { %1672 = vtanh.f32 %v2152_v29 }
 0x444   :  { %v2191_v56 = vpop.f32.mrf.mxu0  ;;  %v2193_v57 = vpop.f32.mrf.mxu1 }
 0x445   :  { %v1673_v21 = vpop.eup %1672 }
 0x446   :  { %v2157_v43 = vmul.f32 %v1673_v21, %v695_v39 }
 0x448   :  { %v714_v44 = vpack.c.bf16 %v2157_v43, %v2157_v43 }
 0x44a   :  { %716 = vrot.lane.b32.xlu0 %v714_v44, %s1921_s2 }
 0x4bc   :  { %v717_v46 = vpop.permute.xlu0 %716 }
 0x4bd   :  { %1581 = vmatmul.msk.bf16.vlgmr.msrb.gmra.mxu0 %vm101_vm0, %v717_v46  ;;  %1582 = vmatmul.msk.bf16.vlgmr.msrb.gmra.mxu1 %vm101_vm0, %v717_v46 }
 0x4be   :  { %1583 = vmatmul.msk.bf16.vlgmr.msra.gmra.mxu2 %vm101_vm0, %v717_v46  ;;  %1046 = vmatpush.bf16.msrb.mxu0 %v1996_v12 }
 0x4bf   :  { %1166 = vmatpush.bf16.msra.mxu2 %v1991_v4  ;;  %1124 = vmatpush.bf16.msrb.mxu1 %v2047_v8 }
 0x4c2   :  { %1047 = vmatpush.bf16.msrb.mxu0 %v2000_v17 }
 0x4c3   :  { %1167 = vmatpush.bf16.msra.mxu2 %v1994_v9  ;;  %1125 = vmatpush.bf16.msrb.mxu1 %v2053_v10 }
 0x4c6   :  { %1048 = vmatpush.bf16.msrb.mxu0 %v2007_v28 }
 0x4c7   :  { %1168 = vmatpush.bf16.msra.mxu2 %v2003_v22  ;;  %1126 = vmatpush.bf16.msrb.mxu1 %v2061_v13 }
 0x4ca   :  { %1049 = vmatpush.bf16.msrb.mxu0 %v2015_v36 }
 0x4cb   :  { %1169 = vmatpush.bf16.msra.mxu2 %v2011_v33  ;;  %1127 = vmatpush.bf16.msrb.mxu1 %v2069_v16 }
 0x53a   :  { %v2196_v59 = vpop.f32.mrf.mxu0  ;;  %v772_v60 = vpop.f32.mrf.mxu1 }
 0x53b   :  { %v789_v61 = vadd.f32 %v772_v60, %v192_v58 }
 0x53d   :  { %v1584_v62 = vmul.f32 -1.442695, %v789_v61 }
 0x53f   :  { %1674 = vpow2.f32 %v1584_v62 }
 0x541   :  { %v785_v63 = vpop.f32.mrf.mxu2 }
 0x542   :  { %v732_v1 = vpop.f32.mrf.mxu0  ;;  %v774_v2 = vpop.f32.mrf.mxu1  ;;  %v790_v14 = vadd.f32 %v785_v63, %v233_v7 }
 0x544   :  { %v1585_v35 = vmul.f32 -1.442695, %v790_v14 }
 0x545   :  { %v1675_v3 = vpop.eup %1674 }
 0x546   :  { %v794_v5 = vadd.f32 1.0, %v1675_v3 }
 0x548   :  { %1676 = vrcp.f32 %v794_v5  ;;  %v806_v19 = vand.u32 2147483648, %v794_v5  ;;  %v804_v24 = vand.u32 2147483647, %v794_v5  ;;  %vm800_vm13 = vweird.f32 %v794_v5 }
 0x549   :  { %v787_v6 = vpop.f32.mrf.mxu2  ;;  %1678 = vtanh.f32 %v790_v14 }
 0x54a   :  { %v807_v26 = vor.u32 1.1754944e-38, %v806_v19  ;;  %vm805_vm15 = vcmp.eq.f32.partialorder %v804_v24, 8.507059e+37  ;;  %1680 = vpow2.f32 %v1585_v35 }
 0x54e   :  { %v1677_v11 = vpop.eup %1676 }
 0x54f   :  { %v796_v15 = vmul.f32 %v1677_v11, %v794_v5  ;;  %vm801_vm2 = vweird.f32 %v1677_v11  ;;  %v1679_v30 = vpop.eup %1678 }
 0x550   :  { %vm802_vm14 = vmor %vm800_vm13, %vm801_vm2  ;;  %v1681_v37 = vpop.eup %1680 }
 0x551   :  { %v797_v18 = vsub.f32 1.0, %v796_v15  ;;  %v814_v38 = vadd.f32 1.0, %v1681_v37 }
 0x553   :  { %v798_v20 = vmul.f32 %v1677_v11, %v797_v18  ;;  %1682 = vrcp.f32 %v814_v38  ;;  %v826_v60 = vand.u32 2147483648, %v814_v38  ;;  %vm820_vm3 = vweird.f32 %v814_v38 }
 0x554   :  { %v824_v61 = vand.u32 2147483647, %v814_v38 }
 0x555   :  { %v799_v25 = vadd.f32 %v1677_v11, %v798_v20  ;;  %v827_v63 = vor.u32 1.1754944e-38, %v826_v60 }
 0x556   :  { %vm825_vm5 = vcmp.eq.f32.partialorder %v824_v61, 8.507059e+37 }
 0x557   :  { %v803_v27 = vsel %vm802_vm14, %v1677_v11, %v799_v25 }
 0x558   :  { %v808_v31 = vsel %vm805_vm15, %v807_v26, %v803_v27 }
 0x559   :  { %v831_v23 = vmul.f32 %v1679_v30, %v808_v31  ;;  %v1683_v21 = vpop.eup %1682  ;;  %v830_v46 = vmul.f32 %v808_v31, %v2152_v29 }
 0x55a   :  { %v816_v39 = vmul.f32 %v1683_v21, %v814_v38  ;;  %vm821_vm1 = vweird.f32 %v1683_v21 }
 0x55b   :  { %833 = vrot.lane.b32.xlu1 %v831_v23, %s1921_s2  ;;  %vm822_vm4 = vmor %vm820_vm3, %vm821_vm1 }
 0x55c   :  { %v817_v44 = vsub.f32 1.0, %v816_v39 }
 0x55e   :  { %v818_v45 = vmul.f32 %v1683_v21, %v817_v44 }
 0x560   :  { %v819_v58 = vadd.f32 %v1683_v21, %v818_v45 }
 0x562   :  { %v823_v62 = vsel %vm822_vm4, %v1683_v21, %v819_v58 }
 0x563   :  { %v828_v2 = vsel %vm825_vm5, %v827_v63, %v823_v62 }
 0x5cd   :  { %v834_v47 = vpop.permute.xlu1 %833 }
 0x5ce   :  { %v2201_v48 = vadd.f32 %v834_v47, %v830_v46 }
 0x5d0   :  { %1684 = vtanh.f32 %v2201_v48 }
 0x5d6   :  { %v1685_v1 = vpop.eup %1684 }
 0x5d7   :  { %v2204_v3 = vmul.f32 %v1685_v1, %v828_v2 }
 0x5d9   :  { %v847_v29 = vpack.c.bf16 %v2204_v3, %v2204_v3 }
 0x5db   :  { %849 = vrot.lane.b32.xlu2 %v847_v29, %s1921_s2 }
 0x635   :  { %v850_v5 = vpop.permute.xlu2 %849 }
 0x636   :  { %1586 = vmatmul.msk.bf16.vlgmr.msra.gmra.mxu3 %vm101_vm0, %v850_v5  ;;  %1587 = vmatmul.msk.bf16.vlgmr.msra.gmra.mxu0 %vm101_vm0, %v850_v5 }
 0x637   :  { %1588 = vmatmul.msk.bf16.vlgmr.msra.gmra.mxu1 %vm101_vm0, %v850_v5  ;;  %1179 = vmatpush.bf16.msra.mxu3 %v1996_v12 }
 0x638   :  { %1299 = vmatpush.bf16.msra.mxu1 %v1991_v4  ;;  %1257 = vmatpush.bf16.msra.mxu0 %v2047_v8  ;;  %v195_v4 = vadd.f32 %v2179_v49, %v2037_v40 }
 0x63b   :  { %1180 = vmatpush.bf16.msra.mxu3 %v2000_v17 }
 0x63c   :  { %1300 = vmatpush.bf16.msra.mxu1 %v1994_v9  ;;  %1258 = vmatpush.bf16.msra.mxu0 %v2053_v10 }
 0x63f   :  { %1181 = vmatpush.bf16.msra.mxu3 %v2007_v28 }
 0x640   :  { %1301 = vmatpush.bf16.msra.mxu1 %v2003_v22  ;;  %1259 = vmatpush.bf16.msra.mxu0 %v2061_v13 }
 0x643   :  { %1182 = vmatpush.bf16.msra.mxu3 %v2015_v36 }
 0x644   :  { %1302 = vmatpush.bf16.msra.mxu1 %v2011_v33  ;;  %1260 = vmatpush.bf16.msra.mxu0 %v2069_v16  ;;  %v236_v33 = vadd.f32 %v2181_v50, %v2040_v51 }
 0x6b3   :  { %v905_v6 = vpop.f32.mrf.mxu0 }
 0x6b4   :  { %v922_v7 = vadd.f32 %v905_v6, %v195_v4  ;;  %v918_v9 = vpop.f32.mrf.mxu1 }
 0x6b5   :  { %v923_v25 = vadd.f32 %v918_v9, %v236_v33 }
 0x6b6   :  { %v1589_v11 = vmul.f32 -1.442695, %v922_v7 }
 0x6b7   :  { %v1590_v50 = vmul.f32 -1.442695, %v923_v25 }
 0x6b8   :  { %1686 = vpow2.f32 %v1589_v11 }
 0x6b9   :  { %v2226_v14 = vpop.f32.mrf.mxu3 }
 0x6bb   :  { %v907_v15 = vpop.f32.mrf.mxu0 }
 0x6bc   :  { %v920_v22 = vpop.f32.mrf.mxu1 }
 0x6bd   :  { %v198_v22 = vadd.f32 %v2183_v52, %v2037_v40 }
 0x6be   :  { %v1687_v18 = vpop.eup %1686 }
 0x6bf   :  { %v927_v19 = vadd.f32 1.0, %v1687_v18 }
 0x6c1   :  { %1688 = vrcp.f32 %v927_v19  ;;  %v865_v20 = vpop.f32.mrf.mxu3  ;;  %v939_v27 = vand.u32 2147483648, %v927_v19  ;;  %v937_v31 = vand.u32 2147483647, %v927_v19  ;;  %vm933_vm7 = vweird.f32 %v927_v19 }
 0x6c2   :  { %1690 = vtanh.f32 %v923_v25 }
 0x6c3   :  { %v940_v35 = vor.u32 1.1754944e-38, %v939_v27  ;;  %vm938_vm9 = vcmp.eq.f32.partialorder %v937_v31, 8.507059e+37  ;;  %1692 = vpow2.f32 %v1590_v50 }
 0x6c7   :  { %v1689_v24 = vpop.eup %1688 }
 0x6c8   :  { %v929_v26 = vmul.f32 %v1689_v24, %v927_v19  ;;  %vm934_vm6 = vweird.f32 %v1689_v24  ;;  %v1691_v38 = vpop.eup %1690 }
 0x6c9   :  { %vm935_vm8 = vmor %vm933_vm7, %vm934_vm6  ;;  %v1693_v44 = vpop.eup %1692 }
 0x6ca   :  { %v930_v49 = vsub.f32 1.0, %v929_v26  ;;  %v947_v45 = vadd.f32 1.0, %v1693_v44 }
 0x6cc   :  { %v931_v30 = vmul.f32 %v1689_v24, %v930_v49  ;;  %1694 = vrcp.f32 %v947_v45  ;;  %v959_v2 = vand.u32 2147483648, %v947_v45  ;;  %vm953_vm11 = vweird.f32 %v947_v45 }
 0x6cd   :  { %v957_v29 = vand.u32 2147483647, %v947_v45 }
 0x6ce   :  { %v932_v23 = vadd.f32 %v1689_v24, %v931_v30  ;;  %v960_v4 = vor.u32 1.1754944e-38, %v959_v2 }
 0x6cf   :  { %vm958_vm2 = vcmp.eq.f32.partialorder %v957_v29, 8.507059e+37 }
 0x6d0   :  { %v936_v37 = vsel %vm935_vm8, %v1689_v24, %v932_v23 }
 0x6d1   :  { %v941_v21 = vsel %vm938_vm9, %v940_v35, %v936_v37 }
 0x6d2   :  { %v964_v39 = vmul.f32 %v1691_v38, %v941_v21  ;;  %v1695_v46 = vpop.eup %1694  ;;  %v963_v61 = vmul.f32 %v941_v21, %v2201_v48 }
 0x6d3   :  { %v949_v47 = vmul.f32 %v1695_v46, %v947_v45  ;;  %vm954_vm10 = vweird.f32 %v1695_v46 }
 0x6d4   :  { %966 = vrot.lane.b32.xlu0 %v964_v39, %s1921_s2  ;;  %vm955_vm12 = vmor %vm953_vm11, %vm954_vm10 }
 0x6d5   :  { %v950_v58 = vsub.f32 1.0, %v949_v47 }
 0x6d7   :  { %v951_v60 = vmul.f32 %v1695_v46, %v950_v58 }
 0x6d9   :  { %v952_v1 = vadd.f32 %v1695_v46, %v951_v60 }
 0x6db   :  { %v956_v5 = vsel %vm955_vm12, %v1695_v46, %v952_v1 }
 0x6dc   :  { %v961_v7 = vsel %vm958_vm2, %v960_v4, %v956_v5 }
 0x746   :  { %v967_v62 = vpop.permute.xlu0 %966 }
 0x747   :  { %v2232_v63 = vadd.f32 %v967_v62, %v963_v61 }
 0x749   :  { %1696 = vtanh.f32 %v2232_v63 }
 0x74f   :  { %v1697_v6 = vpop.eup %1696 }
 0x750   :  { %v2235_v9 = vmul.f32 %v1697_v6, %v961_v7 }
 0x752   :  { %v980_v48 = vpack.c.bf16 %v2235_v9, %v2235_v9 }
 0x754   :  { %982 = vrot.lane.b32.xlu1 %v980_v48, %s1921_s2  ;;  %v201_v48 = vadd.f32 %v2187_v54, %v2037_v40 }
 0x7c6   :  { %v983_v11 = vpop.permute.xlu1 %982 }
 0x7c7   :  { %1591 = vmatmul.msk.bf16.vlgmr.msrb.gmra.mxu2 %vm101_vm0, %v983_v11  ;;  %1592 = vmatmul.msk.bf16.vlgmr.msrb.gmra.mxu3 %vm101_vm0, %v983_v11 }
 0x7c8   :  { %1593 = vmatmul.msk.bf16.vlgmr.msrb.gmra.mxu0 %vm101_vm0, %v983_v11  ;;  %1312 = vmatpush.bf16.msrb.mxu2 %v1996_v12 }
 0x7c9   :  { %1390 = vmatpush.bf16.msrb.mxu3 %v2047_v8 }
 0x7cc   :  { %1313 = vmatpush.bf16.msrb.mxu2 %v2000_v17 }
 0x7cd   :  { %1391 = vmatpush.bf16.msrb.mxu3 %v2053_v10 }
 0x7d0   :  { %1314 = vmatpush.bf16.msrb.mxu2 %v2007_v28 }
 0x7d1   :  { %1392 = vmatpush.bf16.msrb.mxu3 %v2061_v13 }
 0x7d4   :  { %1315 = vmatpush.bf16.msrb.mxu2 %v2015_v36  ;;  %v239_v36 = vadd.f32 %v2185_v53, %v2040_v51 }
 0x7d5   :  { %1393 = vmatpush.bf16.msrb.mxu3 %v2069_v16 }
 0x845   :  { %v1051_v15 = vpop.f32.mrf.mxu0 }
 0x846   :  { %v1056_v16 = vadd.f32 %v1051_v15, %v239_v36 }
 0x848   :  { %v1595_v53 = vmul.f32 -1.442695, %v1056_v16 }
 0x84a   :  { %v2253_v18 = vpop.f32.mrf.mxu2  ;;  %v1038_v12 = vpop.f32.mrf.mxu3 }
 0x84b   :  { %v1055_v8 = vadd.f32 %v1038_v12, %v198_v22 }
 0x84d   :  { %v1594_v19 = vmul.f32 -1.442695, %v1055_v8  ;;  %v1053_v17 = vpop.f32.mrf.mxu0 }
 0x84f   :  { %1698 = vpow2.f32 %v1594_v19 }
 0x852   :  { %v998_v10 = vpop.f32.mrf.mxu2  ;;  %v1040_v20 = vpop.f32.mrf.mxu3 }
 0x855   :  { %v1699_v28 = vpop.eup %1698 }
 0x856   :  { %v1060_v33 = vadd.f32 1.0, %v1699_v28  ;;  %v242_v28 = vadd.f32 %v2189_v55, %v2040_v51  ;;  %v1636_v55 = vld [vmem:[%s2393_s5] ss:$0 sm:$0xff] }
 0x858   :  { %1700 = vrcp.f32 %v1060_v33  ;;  %v1072_v52 = vand.u32 2147483648, %v1060_v33  ;;  %v1070_v49 = vand.u32 2147483647, %v1060_v33  ;;  %vm1066_vm14 = vweird.f32 %v1060_v33 }
 0x859   :  { %1702 = vtanh.f32 %v1056_v16 }
 0x85a   :  { %v1073_v30 = vor.u32 1.1754944e-38, %v1072_v52  ;;  %vm1071_vm1 = vcmp.eq.f32.partialorder %v1070_v49, 8.507059e+37  ;;  %1704 = vpow2.f32 %v1595_v53 }
 0x85e   :  { %v1701_v13 = vpop.eup %1700 }
 0x85f   :  { %v1062_v24 = vmul.f32 %v1701_v13, %v1060_v33  ;;  %vm1067_vm13 = vweird.f32 %v1701_v13  ;;  %v1703_v23 = vpop.eup %1702 }
 0x860   :  { %vm1068_vm15 = vmor %vm1066_vm14, %vm1067_vm13  ;;  %v1705_v38 = vpop.eup %1704 }
 0x861   :  { %v1063_v25 = vsub.f32 1.0, %v1062_v24  ;;  %v1080_v21 = vadd.f32 1.0, %v1705_v38 }
 0x863   :  { %v1064_v26 = vmul.f32 %v1701_v13, %v1063_v25  ;;  %1706 = vrcp.f32 %v1080_v21  ;;  %v1092_v61 = vand.u32 2147483648, %v1080_v21  ;;  %vm1086_vm4 = vweird.f32 %v1080_v21 }
 0x864   :  { %v1090_v62 = vand.u32 2147483647, %v1080_v21 }
 0x865   :  { %v1065_v27 = vadd.f32 %v1701_v13, %v1064_v26  ;;  %v1093_v2 = vor.u32 1.1754944e-38, %v1092_v61 }
 0x866   :  { %vm1091_vm6 = vcmp.eq.f32.partialorder %v1090_v62, 8.507059e+37 }
 0x867   :  { %v1069_v31 = vsel %vm1068_vm15, %v1701_v13, %v1065_v27 }
 0x868   :  { %v1074_v35 = vsel %vm1071_vm1, %v1073_v30, %v1069_v31 }
 0x869   :  { %v1097_v37 = vmul.f32 %v1703_v23, %v1074_v35  ;;  %v1707_v39 = vpop.eup %1706  ;;  %v1096_v46 = vmul.f32 %v1074_v35, %v2232_v63 }
 0x86a   :  { %v1082_v50 = vmul.f32 %v1707_v39, %v1080_v21  ;;  %vm1087_vm3 = vweird.f32 %v1707_v39 }
 0x86b   :  { %1099 = vrot.lane.b32.xlu2 %v1097_v37, %s1921_s2  ;;  %vm1088_vm5 = vmor %vm1086_vm4, %vm1087_vm3 }
 0x86c   :  { %v1083_v44 = vsub.f32 1.0, %v1082_v50 }
 0x86e   :  { %v1084_v45 = vmul.f32 %v1707_v39, %v1083_v44 }
 0x870   :  { %v1085_v60 = vadd.f32 %v1707_v39, %v1084_v45 }
 0x872   :  { %v1089_v1 = vsel %vm1088_vm5, %v1707_v39, %v1085_v60 }
 0x873   :  { %v1094_v5 = vsel %vm1091_vm6, %v1093_v2, %v1089_v1 }
 0x8c5   :  { %v1100_v47 = vpop.permute.xlu2 %1099 }
 0x8c6   :  { %v2259_v58 = vadd.f32 %v1100_v47, %v1096_v46 }
 0x8c8   :  { %1708 = vtanh.f32 %v2259_v58 }
 0x8ce   :  { %v1709_v29 = vpop.eup %1708 }
 0x8cf   :  { %v2262_v4 = vmul.f32 %v1709_v29, %v1094_v5 }
 0x8d1   :  { %v1113_v63 = vpack.c.bf16 %v2262_v4, %v2262_v4 }
 0x8d3   :  { %1115 = vrot.lane.b32.xlu0 %v1113_v63, %s1921_s2 }
 0x945   :  { %v1116_v6 = vpop.permute.xlu0 %1115 }
 0x946   :  { %1596 = vmatmul.msk.bf16.vlgmr.msrb.gmra.mxu1 %vm101_vm0, %v1116_v6  ;;  %1597 = vmatmul.msk.bf16.vlgmr.msra.gmra.mxu2 %vm101_vm0, %v1116_v6 }
 0x947   :  { %1598 = vmatmul.msk.bf16.vlgmr.msra.gmra.mxu3 %vm101_vm0, %v1116_v6 }
 0x9c3   :  { %v2270_v7 = vpop.f32.mrf.mxu1 }
 0x9c9   :  { %v1171_v11 = vpop.f32.mrf.mxu2 }
 0x9ca   :  { %v1188_v15 = vadd.f32 %v1171_v11, %v201_v48  ;;  %v1184_v22 = vpop.f32.mrf.mxu3 }
 0x9cb   :  { %v1131_v12 = vpop.f32.mrf.mxu1  ;;  %v1189_v36 = vadd.f32 %v1184_v22, %v242_v28 }
 0x9cc   :  { %v1599_v8 = vmul.f32 -1.442695, %v1188_v15 }
 0x9cd   :  { %v1600_v23 = vmul.f32 -1.442695, %v1189_v36 }
 0x9ce   :  { %1710 = vpow2.f32 %v1599_v8 }
 0x9d1   :  { %v1173_v19 = vpop.f32.mrf.mxu2 }
 0x9d2   :  { %v1186_v17 = vpop.f32.mrf.mxu3 }
 0x9d4   :  { %v1711_v10 = vpop.eup %1710 }
 0x9d5   :  { %v1193_v20 = vadd.f32 1.0, %v1711_v10 }
 0x9d7   :  { %1712 = vrcp.f32 %v1193_v20  ;;  %v1205_v54 = vand.u32 2147483648, %v1193_v20  ;;  %v1203_v25 = vand.u32 2147483647, %v1193_v20  ;;  %vm1199_vm8 = vweird.f32 %v1193_v20 }
 0x9d8   :  { %1714 = vtanh.f32 %v1189_v36  ;;  %v245_v36 = vadd.f32 %v2193_v57, %v2040_v51 }
 0x9d9   :  { %v1206_v26 = vor.u32 1.1754944e-38, %v1205_v54  ;;  %vm1204_vm10 = vcmp.eq.f32.partialorder %v1203_v25, 8.507059e+37  ;;  %1716 = vpow2.f32 %v1600_v23 }
 0x9dd   :  { %v1713_v33 = vpop.eup %1712 }
 0x9de   :  { %v1195_v13 = vmul.f32 %v1713_v33, %v1193_v20  ;;  %vm1200_vm7 = vweird.f32 %v1713_v33  ;;  %v1715_v27 = vpop.eup %1714 }
 0x9df   :  { %vm1201_vm9 = vmor %vm1199_vm8, %vm1200_vm7  ;;  %v1717_v35 = vpop.eup %1716  ;;  %vm104_vm8 = vcmask 7168  }
 0x9e0   :  { %v1196_v16 = vsub.f32 1.0, %v1195_v13  ;;  %v1213_v37 = vadd.f32 1.0, %v1717_v35  ;;  %106 = vst.msk [vmem:[#allocation6] sm:$0xff] %vm104_vm8, %v1920_v0 }
 0x9e2   :  { %v1197_v24 = vmul.f32 %v1713_v33, %v1196_v16  ;;  %1718 = vrcp.f32 %v1213_v37  ;;  %v1225_v47 = vand.u32 2147483648, %v1213_v37  ;;  %vm1219_vm12 = vweird.f32 %v1213_v37 }
 0x9e3   :  { %v1223_v60 = vand.u32 2147483647, %v1213_v37 }
 0x9e4   :  { %v1198_v52 = vadd.f32 %v1713_v33, %v1197_v24  ;;  %v1226_v62 = vor.u32 1.1754944e-38, %v1225_v47 }
 0x9e5   :  { %vm1224_vm13 = vcmp.eq.f32.partialorder %v1223_v60, 8.507059e+37 }
 0x9e6   :  { %v1202_v49 = vsel %vm1201_vm9, %v1713_v33, %v1198_v52  ;;  %vm107_vm9 = vcmask 261120  }
 0x9e7   :  { %v1207_v30 = vsel %vm1204_vm10, %v1206_v26, %v1202_v49  ;;  %108 = vst.msk [vmem:[#allocation7] sm:$0xff] %vm107_vm9, %v1920_v0 }
 0x9e8   :  { %v1230_v31 = vmul.f32 %v1715_v27, %v1207_v30  ;;  %v1719_v53 = vpop.eup %1718  ;;  %v1229_v50 = vmul.f32 %v1207_v30, %v2259_v58 }
 0x9e9   :  { %v1215_v38 = vmul.f32 %v1719_v53, %v1213_v37  ;;  %vm1220_vm11 = vweird.f32 %v1719_v53 }
 0x9ea   :  { %1232 = vrot.lane.b32.xlu1 %v1230_v31, %s1921_s2  ;;  %vm1221_vm2 = vmor %vm1219_vm12, %vm1220_vm11 }
 0x9eb   :  { %v1216_v21 = vsub.f32 1.0, %v1215_v38 }
 0x9ed   :  { %v1217_v39 = vmul.f32 %v1719_v53, %v1216_v21 }
 0x9ef   :  { %v1218_v46 = vadd.f32 %v1719_v53, %v1217_v39 }
 0x9f1   :  { %v1222_v61 = vsel %vm1221_vm2, %v1719_v53, %v1218_v46 }
 0x9f2   :  { %414 = vrot.lane.b32.xlu1 %v1636_v55, %s1921_s2  ;;  %v1227_v29 = vsel %vm1224_vm13, %v1226_v62, %v1222_v61 }
 0xa5c   :  { %v1233_v44 = vpop.permute.xlu1 %1232 }
 0xa5d   :  { %v2282_v45 = vadd.f32 %v1233_v44, %v1229_v50 }
 0xa5f   :  { %1720 = vtanh.f32 %v2282_v45 }
 0xa64   :  { %v2285_v1 = vpop.permute.xlu1 %414 }
 0xa65   :  { %v1721_v2 = vpop.eup %1720  ;;  %v573_v58 = vmul.f32 %v2118_v34, %v2285_v1  ;;  %v972_v6 = vmul.f32 %v2235_v9, %v2285_v1  ;;  %v706_v48 = vmul.f32 %v2157_v43, %v2285_v1  ;;  %v1105_v34 = vmul.f32 %v2262_v4, %v2285_v1 }
 0xa66   :  { %v1237_v5 = vmul.f32 %v1721_v2, %v1227_v29  ;;  %v204_v43 = vadd.f32 %v2191_v56, %v2037_v40  ;;  %v417_v51 = vmul.f32 %v2285_v1, %v2086_v32  ;;  %v839_v57 = vmul.f32 %v2204_v3, %v2285_v1 }
 0xa67   :  { %575 = vrot.lane.b32.xlu1 %v573_v58, %s1921_s2 }
 0xa68   :  { %v1246_v63 = vpack.c.bf16 %v1237_v5, %v1237_v5  ;;  %v1238_v55 = vmul.f32 %v1237_v5, %v2285_v1 }
 0xa6a   :  { %1248 = vrot.lane.b32.xlu2 %v1246_v63, %s1921_s2 }
 0xa6f   :  { %974 = vrot.lane.b32.xlu1 %v972_v6, %s1921_s2 }
 0xa72   :  { %708 = vrot.lane.b32.xlu2 %v706_v48, %s1921_s2 }
 0xa7a   :  { %1107 = vrot.lane.b32.xlu2 %v1105_v34, %s1921_s2 }
 0xac4   :  { %v1249_v11 = vpop.permute.xlu2 %1248 }
 0xac5   :  { %1601 = vmatmul.msk.bf16.vlgmr.msra.gmra.mxu0 %vm101_vm0, %v1249_v11  ;;  %1602 = vmatmul.msk.bf16.vlgmr.msra.gmra.mxu1 %vm101_vm0, %v1249_v11 }
 0xac6   :  { %1603 = vmatmul.msk.bf16.vlgmr.msrb.gmra.mxu2 %vm101_vm0, %v1249_v11 }
 0xacc   :  { %v709_v9 = vpop.permute.xlu2 %708 }
 0xacd   :  { %v711_v15 = vsel %vm101_vm0, %v709_v9, 0.0 }
 0xace   :  { %712 = vadd.xlane.f32.xlu1 %v711_v15 }
 0xad4   :  { %v1108_v37 = vpop.permute.xlu2 %1107 }
 0xad5   :  { %v1110_v53 = vsel %vm101_vm0, %v1108_v37, 0.0 }
 0xad9   :  { %v576_v23 = vpop.permute.xlu1 %575 }
 0xada   :  { %v578_v35 = vsel %vm101_vm0, %v576_v23, 0.0 }
 0xb42   :  { %v2306_v22 = vpop.f32.mrf.mxu0  ;;  %v1304_v12 = vpop.f32.mrf.mxu1 }
 0xb43   :  { %v1321_v4 = vadd.f32 %v1304_v12, %v204_v43  ;;  %v1922_v12 = vmov -inf  }
 0xb44   :  { %105 = vst.msk [vmem:[#allocation5] sm:$0xff] %vm104_vm8, %v1922_v12 }
 0xb45   :  { %v1604_v8 = vmul.f32 -1.442695, %v1321_v4  ;;  %v975_v4 = vpop.permute.xlu1 %974 }
 0xb47   :  { %1722 = vpow2.f32 %v1604_v8  ;;  %v977_v8 = vsel %vm101_vm0, %v975_v4, 0.0 }
 0xb49   :  { %v1317_v19 = vpop.f32.mrf.mxu2 }
 0xb4a   :  { %v1264_v17 = vpop.f32.mrf.mxu0  ;;  %v1306_v10 = vpop.f32.mrf.mxu1  ;;  %v1322_v16 = vadd.f32 %v1317_v19, %v245_v36  ;;  %v1923_v19 = vmov 0  }
 0xb4b   :  { %1634 = vset.pattern.permute.xlu1 %v1923_v19  ;;  %1633 = vset.pattern.permute.xlu0 %v1923_v19  ;;  %v282_v17 = vld [vmem:[#allocation5] sm:$0xff] }
 0xb4c   :  { %v1605_v32 = vmul.f32 -1.442695, %v1322_v16  ;;  %1635 = vset.pattern.permute.xlu2 %v1923_v19 }
 0xb4d   :  { %v1723_v20 = vpop.eup %1722 }
 0xb4e   :  { %v1326_v28 = vadd.f32 1.0, %v1723_v20 }
 0xb50   :  { %1724 = vrcp.f32 %v1326_v28  ;;  %v1338_v56 = vand.u32 2147483648, %v1326_v28  ;;  %v1336_v25 = vand.u32 2147483647, %v1326_v28  ;;  %vm1332_vm15 = vweird.f32 %v1326_v28 }
 0xb51   :  { %v1319_v33 = vpop.f32.mrf.mxu2  ;;  %1726 = vtanh.f32 %v1322_v16  ;;  %v713_v16 = vpop.xlane.xlu1 %712 }
 0xb52   :  { %v1339_v26 = vor.u32 1.1754944e-38, %v1338_v56  ;;  %vm1337_vm3 = vcmp.eq.f32.partialorder %v1336_v25, 8.507059e+37  ;;  %1728 = vpow2.f32 %v1605_v32 }
 0xb56   :  { %v1725_v13 = vpop.eup %1724 }
 0xb57   :  { %v1328_v54 = vmul.f32 %v1725_v13, %v1326_v28  ;;  %vm1333_vm14 = vweird.f32 %v1725_v13  ;;  %v1727_v27 = vpop.eup %1726 }
 0xb58   :  { %vm1334_vm1 = vmor %vm1332_vm15, %vm1333_vm14  ;;  %v1729_v38 = vpop.eup %1728 }
 0xb59   :  { %v1329_v40 = vsub.f32 1.0, %v1328_v54  ;;  %v1346_v21 = vadd.f32 1.0, %v1729_v38 }
 0xb5b   :  { %v1330_v24 = vmul.f32 %v1725_v13, %v1329_v40  ;;  %1730 = vrcp.f32 %v1346_v21  ;;  %v1358_v62 = vand.u32 2147483648, %v1346_v21  ;;  %vm1352_vm5 = vweird.f32 %v1346_v21 }
 0xb5c   :  { %v1356_v2 = vand.u32 2147483647, %v1346_v21 }
 0xb5d   :  { %v1331_v52 = vadd.f32 %v1725_v13, %v1330_v24  ;;  %v1359_v29 = vor.u32 1.1754944e-38, %v1358_v62 }
 0xb5e   :  { %vm1357_vm7 = vcmp.eq.f32.partialorder %v1356_v2, 8.507059e+37 }
 0xb5f   :  { %v1335_v49 = vsel %vm1334_vm1, %v1725_v13, %v1331_v52 }
 0xb60   :  { %v1340_v30 = vsel %vm1337_vm3, %v1339_v26, %v1335_v49 }
 0xb61   :  { %v1363_v31 = vmul.f32 %v1727_v27, %v1340_v30  ;;  %v1731_v3 = vpop.eup %1730  ;;  %v1362_v46 = vmul.f32 %v1340_v30, %v2282_v45 }
 0xb62   :  { %v1348_v39 = vmul.f32 %v1731_v3, %v1346_v21  ;;  %vm1353_vm4 = vweird.f32 %v1731_v3 }
 0xb63   :  { %1365 = vrot.lane.b32.xlu0 %v1363_v31, %s1921_s2  ;;  %vm1354_vm6 = vmor %vm1352_vm5, %vm1353_vm4 }
 0xb64   :  { %v1349_v50 = vsub.f32 1.0, %v1348_v39 }
 0xb66   :  { %v1350_v44 = vmul.f32 %v1731_v3, %v1349_v50 }
 0xb68   :  { %v1351_v61 = vadd.f32 %v1731_v3, %v1350_v44 }
 0xb6a   :  { %v1355_v58 = vsel %vm1354_vm6, %v1731_v3, %v1351_v61 }
 0xb6b   :  { %419 = vrot.lane.b32.xlu0 %v417_v51, %s1921_s2  ;;  %v1360_v48 = vsel %vm1357_vm7, %v1359_v29, %v1355_v58  ;;  %v283_v51 = vld [vmem:[#allocation6] sm:$0xff] }
 0xb73   :  { %841 = vrot.lane.b32.xlu0 %v839_v57, %s1921_s2 }
 0xb7b   :  { %1240 = vrot.lane.b32.xlu0 %v1238_v55, %s1921_s2 }
 0xba5   :  { %579 = vadd.xlane.f32.xlu0 %v578_v35 }
 0xbad   :  { %1111 = vadd.xlane.f32.xlu0 %v1110_v53 }
 0xbd5   :  { %v1366_v47 = vpop.permute.xlu0 %1365 }
 0xbd6   :  { %v2322_v60 = vadd.f32 %v1366_v47, %v1362_v46 }
 0xbd8   :  { %1732 = vtanh.f32 %v2322_v60 }
 0xbdd   :  { %v420_v5 = vpop.permute.xlu0 %419 }
 0xbde   :  { %v1733_v63 = vpop.eup %1732  ;;  %v422_v6 = vsel %vm101_vm0, %v420_v5, 0.0 }
 0xbdf   :  { %423 = vadd.xlane.f32.xlu2 %v422_v6  ;;  %v2326_v45 = vmul.f32 %v1733_v63, %v1360_v48 }
 0xbe1   :  { %v1371_v34 = vmul.f32 %v2326_v45, %v2285_v1  ;;  %v1379_v15 = vpack.c.bf16 %v2326_v45, %v2326_v45 }
 0xbe3   :  { %1373 = vrot.lane.b32.xlu1 %v1371_v34, %s1921_s2 }
 0xbe5   :  { %v842_v11 = vpop.permute.xlu0 %841 }
 0xbe6   :  { %v844_v9 = vsel %vm101_vm0, %v842_v11, 0.0 }
 0xbe7   :  { %845 = vadd.xlane.f32.xlu2 %v844_v9 }
 0xbed   :  { %v1241_v43 = vpop.permute.xlu0 %1240 }
 0xbee   :  { %v1243_v1 = vsel %vm101_vm0, %v1241_v43, 0.0 }
 0xbff   :  { %1381 = vrot.lane.b32.xlu2 %v1379_v15, %s1921_s2 }
 0xc0d   :  { %1244 = vadd.xlane.f32.xlu1 %v1243_v1 }
 0xc18   :  { %v580_v28 = vpop.xlane.xlu0 %579 }
 0xc20   :  { %v1112_v15 = vpop.xlane.xlu0 %1111 }
 0xc28   :  { %978 = vadd.xlane.f32.xlu2 %v977_v8 }
 0xc52   :  { %v424_v10 = vpop.xlane.xlu2 %423 }
 0xc53   :  { %v472_v20 = vmax.f32 %v282_v17, %v424_v10 }
 0xc55   :  { %v473_v33 = vsub.f32 %v282_v17, %v472_v20  ;;  %v476_v36 = vsub.f32 %v424_v10, %v472_v20  ;;  %v605_v13 = vmax.f32 %v472_v20, %v580_v28  ;;  %v1374_v48 = vpop.permute.xlu1 %1373 }
 0xc56   :  { %v1376_v34 = vsel %vm101_vm0, %v1374_v48, 0.0 }
 0xc57   :  { %v474_v54 = vmul.f32 1.442695, %v473_v33  ;;  %v477_v40 = vmul.f32 1.442695, %v476_v36  ;;  %v606_v56 = vsub.f32 %v472_v20, %v605_v13  ;;  %v609_v24 = vsub.f32 %v580_v28, %v605_v13 }
 0xc58   :  { %v738_v25 = vmax.f32 %v605_v13, %v713_v16 }
 0xc59   :  { %1734 = vpow2.f32 %v474_v54  ;;  %v607_v52 = vmul.f32 1.442695, %v606_v56  ;;  %v610_v27 = vmul.f32 1.442695, %v609_v24 }
 0xc5a   :  { %1736 = vpow2.f32 %v477_v40  ;;  %v846_v26 = vpop.xlane.xlu2 %845  ;;  %v739_v49 = vsub.f32 %v605_v13, %v738_v25  ;;  %v742_v30 = vsub.f32 %v713_v16, %v738_v25 }
 0xc5b   :  { %1738 = vpow2.f32 %v607_v52  ;;  %v871_v31 = vmax.f32 %v738_v25, %v846_v26 }
 0xc5c   :  { %v740_v57 = vmul.f32 1.442695, %v739_v49  ;;  %1740 = vpow2.f32 %v610_v27  ;;  %v743_v37 = vmul.f32 1.442695, %v742_v30 }
 0xc5d   :  { %v872_v55 = vsub.f32 %v738_v25, %v871_v31  ;;  %v875_v23 = vsub.f32 %v846_v26, %v871_v31 }
 0xc5e   :  { %1742 = vpow2.f32 %v740_v57 }
 0xc5f   :  { %v1735_v35 = vpop.eup %1734  ;;  %v876_v53 = vmul.f32 1.442695, %v875_v23  ;;  %v873_v3 = vmul.f32 1.442695, %v872_v55  ;;  %v470_v23 = vld [vmem:[#allocation11] sm:$0xff] }
 0xc60   :  { %v1737_v32 = vpop.eup %1736  ;;  %v479_v38 = vmul.f32 %v1735_v35, %v283_v51  ;;  %483 = vperm.xlu0 %1633, %v1735_v35   ;;  %v284_v35 = vld [vmem:[#allocation7] sm:$0xff] }
 0xc61   :  { %v1739_v21 = vpop.eup %1738  ;;  %489 = vperm.xlu1 %1634, %v1737_v32   ;;  %1744 = vpow2.f32 %v876_v53 }
 0xc62   :  { %v480_v39 = vadd.f32 %v1737_v32, %v479_v38  ;;  %v1382_v50 = vpop.permute.xlu2 %1381  ;;  %616 = vperm.xlu2 %1635, %v1739_v21   ;;  %1746 = vpow2.f32 %v743_v37  ;;  %v1741_v46 = vpop.eup %1740 }
 0xc63   :  { %1606 = vmatmul.msk.bf16.vlgmr.msrb.gmra.mxu3 %vm101_vm0, %v1382_v50  ;;  %1748 = vpow2.f32 %v873_v3  ;;  %v603_v50 = vld [vmem:[#allocation11 + $0x8] sm:$0xff] }
 0xc64   :  { %v612_v44 = vmul.f32 %v1739_v21, %v480_v39  ;;  %v1743_v61 = vpop.eup %1742 }
 0xc66   :  { %v613_v47 = vadd.f32 %v1741_v46, %v612_v44 }
 0xc67   :  { %v1745_v62 = vpop.eup %1744 }
 0xc68   :  { %v745_v2 = vmul.f32 %v1743_v61, %v613_v47  ;;  %v1747_v58 = vpop.eup %1746  ;;  %888 = vperm.xlu0 %1633, %v1745_v62  }
 0xc69   :  { %622 = vperm.xlu1 %1634, %v1741_v46   ;;  %v1749_v5 = vpop.eup %1748 }
 0xc6a   :  { %v746_v29 = vadd.f32 %v1747_v58, %v745_v2  ;;  %749 = vperm.xlu2 %1635, %v1743_v61  }
 0xc6c   :  { %v878_v63 = vmul.f32 %v1749_v5, %v746_v29 }
 0xc6e   :  { %v879_v6 = vadd.f32 %v1745_v62, %v878_v63 }
 0xc71   :  { %755 = vperm.xlu1 %1634, %v1747_v58   ;;  %v736_v58 = vld [vmem:[#allocation11 + $0x10] sm:$0xff] }
 0xc80   :  { %v1245_v4 = vpop.xlane.xlu1 %1244 }
 0xc93   :  { %1377 = vadd.xlane.f32.xlu2 %v1376_v34 }
 0xc9b   :  { %v979_v11 = vpop.xlane.xlu2 %978 }
 0xc9c   :  { %v1004_v9 = vmax.f32 %v871_v31, %v979_v11 }
 0xc9e   :  { %v1005_v43 = vsub.f32 %v871_v31, %v1004_v9  ;;  %v1008_v12 = vsub.f32 %v979_v11, %v1004_v9  ;;  %v1137_v1 = vmax.f32 %v1004_v9, %v1112_v15 }
 0xca0   :  { %v1006_v8 = vmul.f32 1.442695, %v1005_v43  ;;  %v1009_v19 = vmul.f32 1.442695, %v1008_v12  ;;  %v1138_v17 = vsub.f32 %v1004_v9, %v1137_v1  ;;  %v1141_v10 = vsub.f32 %v1112_v15, %v1137_v1  ;;  %v869_v12 = vld [vmem:[#allocation11 + $0x18] sm:$0xff] }
 0xca1   :  { %v2342_v20 = vmax.f32 %v1137_v1, %v1245_v4 }
 0xca2   :  { %1750 = vpow2.f32 %v1006_v8  ;;  %v1139_v28 = vmul.f32 1.442695, %v1138_v17  ;;  %v1142_v36 = vmul.f32 1.442695, %v1141_v10 }
 0xca3   :  { %1752 = vpow2.f32 %v1009_v19  ;;  %v1271_v33 = vsub.f32 %v1137_v1, %v2342_v20  ;;  %v1274_v13 = vsub.f32 %v1245_v4, %v2342_v20 }
 0xca4   :  { %1754 = vpow2.f32 %v1139_v28 }
 0xca5   :  { %v1272_v16 = vmul.f32 1.442695, %v1271_v33  ;;  %1756 = vpow2.f32 %v1142_v36  ;;  %v1275_v40 = vmul.f32 1.442695, %v1274_v13 }
 0xca7   :  { %1758 = vpow2.f32 %v1272_v16 }
 0xca8   :  { %v1751_v54 = vpop.eup %1750  ;;  %1760 = vpow2.f32 %v1275_v40 }
 0xca9   :  { %v1753_v56 = vpop.eup %1752  ;;  %v1011_v24 = vmul.f32 %v1751_v54, %v879_v6  ;;  %1015 = vperm.xlu1 %1634, %v1751_v54   ;;  %1762 = vtanh.f32 %v2110_v41  ;;  %v1002_v54 = vld [vmem:[#allocation11 + $0x20] sm:$0xff] }
 0xcaa   :  { %v1755_v25 = vpop.eup %1754  ;;  %1764 = vtanh.f32 %v2141_v42 }
 0xcab   :  { %v1012_v52 = vadd.f32 %v1753_v56, %v1011_v24  ;;  %882 = vperm.xlu2 %1635, %v1749_v5   ;;  %1148 = vperm.xlu0 %1633, %v1755_v25   ;;  %v1757_v49 = vpop.eup %1756  ;;  %1766 = vtanh.f32 %v2196_v59 }
 0xcac   :  { %1768 = vtanh.f32 %v2226_v14 }
 0xcad   :  { %v1144_v26 = vmul.f32 %v1755_v25, %v1012_v52  ;;  %v1759_v30 = vpop.eup %1758 }
 0xcae   :  { %v1761_v51 = vpop.eup %1760 }
 0xcaf   :  { %v1145_v27 = vadd.f32 %v1757_v49, %v1144_v26  ;;  %v1763_v55 = vpop.eup %1762 }
 0xcb0   :  { %v471_v37 = vmul.f32 %v1763_v55, %v470_v23  ;;  %v1765_v39 = vpop.eup %1764 }
 0xcb1   :  { %1154 = vperm.xlu1 %1634, %v1757_v49   ;;  %v1277_v31 = vmul.f32 %v1759_v30, %v1145_v27  ;;  %v604_v46 = vmul.f32 %v1765_v39, %v603_v50  ;;  %v1767_v62 = vpop.eup %1766  ;;  %v1450_v39 = vld [vmem:[%s2395_s7] sm:$0xff] }
 0xcb2   :  { %v737_v29 = vmul.f32 %v1767_v62, %v736_v58  ;;  %v1769_v43 = vpop.eup %1768 }
 0xcb3   :  { %1021 = vperm.xlu2 %1635, %v1753_v56   ;;  %1287 = vperm.xlu0 %1633, %v1761_v51   ;;  %v1278_v57 = vadd.f32 %v1761_v51, %v1277_v31  ;;  %v870_v19 = vmul.f32 %v1769_v43, %v869_v12 }
 0xcbb   :  { %1281 = vperm.xlu2 %1635, %v1759_v30   ;;  %v1135_v30 = vld [vmem:[#allocation11 + $0x28] sm:$0xff] }
 0xcbc   :  { %v617_v21 = vpop.permute.xlu2 %616 }
 0xcc4   :  { %v750_v2 = vpop.permute.xlu2 %749 }
 0xcd2   :  { %v484_v53 = vpop.permute.xlu0 %483 }
 0xcd3   :  { %v490_v0 = vpop.permute.xlu1 %489  ;;  %v486_v32 = vmul.f32 %v484_v53, %v284_v35 }
 0xcd4   :  { %v492_v38 = vmul.f32 %v490_v0, %v471_v37 }
 0xcd6   :  { %v493_v3 = vadd.f32 %v492_v38, %v486_v32  ;;  %v1452_v38 = vld [vmem:[%s2395_s7 + $0x10] sm:$0xff] }
 0xcd8   :  { %v619_v44 = vmul.f32 %v617_v21, %v493_v3  ;;  %v1451_v21 = vld [vmem:[%s2395_s7 + $0x8] sm:$0xff] }
 0xcda   :  { %v889_v8 = vpop.permute.xlu0 %888 }
 0xcdb   :  { %v623_v47 = vpop.permute.xlu1 %622  ;;  %v891_v10 = vmul.f32 %v889_v8, %v870_v19 }
 0xcdc   :  { %v625_v41 = vmul.f32 %v623_v47, %v604_v46  ;;  %v1401_v46 = vld [vmem:[#allocation11 + $0x38] sm:$0xff] }
 0xcde   :  { %v626_v61 = vadd.f32 %v625_v41, %v619_v44 }
 0xce0   :  { %v752_v42 = vmul.f32 %v750_v2, %v626_v61 }
 0xce3   :  { %v756_v5 = vpop.permute.xlu1 %755 }
 0xce4   :  { %v758_v63 = vmul.f32 %v756_v5, %v737_v29  ;;  %v1637_v5 = vld [vmem:[%s2396_s8] ss:$0 sm:$0xff] }
 0xce6   :  { %v2351_v6 = vpop.f32.mrf.mxu3  ;;  %v759_v48 = vadd.f32 %v758_v63, %v752_v42 }
 0xcee   :  { %v1397_v34 = vpop.f32.mrf.mxu3 }
 0xd06   :  { %v1378_v11 = vpop.xlane.xlu2 %1377 }
 0xd07   :  { %v1403_v59 = vmax.f32 %v2342_v20, %v1378_v11 }
 0xd09   :  { %v1404_v9 = vsub.f32 %v2342_v20, %v1403_v59  ;;  %v1407_v15 = vsub.f32 %v1378_v11, %v1403_v59  ;;  %1436 = vst.msk [vmem:[#allocation5] sm:$0xff] %vm104_vm8, %v1403_v59 }
 0xd0b   :  { %v1405_v1 = vmul.f32 1.442695, %v1404_v9  ;;  %v1408_v4 = vmul.f32 1.442695, %v1407_v15 }
 0xd0d   :  { %1770 = vpow2.f32 %v1405_v1 }
 0xd0e   :  { %1772 = vpow2.f32 %v1408_v4  ;;  %v883_v17 = vpop.permute.xlu2 %882 }
 0xd0f   :  { %v885_v28 = vmul.f32 %v883_v17, %v759_v48  ;;  %1774 = vtanh.f32 %v2253_v18 }
 0xd11   :  { %v892_v14 = vadd.f32 %v891_v10, %v885_v28 }
 0xd13   :  { %v1771_v33 = vpop.eup %1770 }
 0xd14   :  { %v1773_v36 = vpop.eup %1772  ;;  %v1410_v20 = vmul.f32 %v1771_v33, %v1278_v57  ;;  %1414 = vperm.xlu1 %1634, %v1771_v33   ;;  %v1268_v57 = vld [vmem:[#allocation11 + $0x30] sm:$0xff] }
 0xd15   :  { %1420 = vperm.xlu2 %1635, %v1773_v36   ;;  %v1775_v16 = vpop.eup %1774 }
 0xd16   :  { %v1411_v13 = vadd.f32 %v1773_v36, %v1410_v20  ;;  %v1022_v40 = vpop.permute.xlu2 %1021  ;;  %v1003_v56 = vmul.f32 %v1775_v16, %v1002_v54 }
 0xd18   :  { %1437 = vst.msk [vmem:[#allocation6] sm:$0xff] %vm104_vm8, %v1411_v13  ;;  %1776 = vrcp.f32 %v1411_v13  ;;  %v1024_v25 = vmul.f32 %v1022_v40, %v1003_v56 }
 0xd19   :  { %1778 = vtanh.f32 %v2270_v7 }
 0xd1a   :  { %1780 = vtanh.f32 %v2306_v22 }
 0xd1b   :  { %v1016_v24 = vpop.permute.xlu1 %1015  ;;  %1782 = vtanh.f32 %v2351_v6 }
 0xd1c   :  { %v1018_v52 = vmul.f32 %v1016_v24, %v892_v14  ;;  %1426 = vrot.lane.b32.xlu1 %v2326_v45, %s1921_s2 }
 0xd1d   :  { %1431 = vrot.lane.b32.xlu2 %v2322_v60, %s1921_s2  ;;  %v1149_v18 = vpop.permute.xlu0 %1148  ;;  %v1453_v60 = vld [vmem:[%s2395_s7 + $0x18] sm:$0xff] }
 0xd1e   :  { %v1777_v26 = vpop.eup %1776  ;;  %v1025_v49 = vadd.f32 %v1024_v25, %v1018_v52  ;;  %v1282_v53 = vpop.permute.xlu2 %1281  ;;  %1473 = vmatpush.msrb.mxu0 %v1453_v60 }
 0xd1f   :  { %v1779_v27 = vpop.eup %1778  ;;  %1446 = vperm.xlu0 %1633, %v1777_v26  }
 0xd20   :  { %v1136_v7 = vmul.f32 %v1779_v27, %v1135_v30  ;;  %v1781_v31 = vpop.eup %1780  ;;  %v1151_v55 = vmul.f32 %v1149_v18, %v1025_v49  ;;  %1474 = vmatpush.msrb.mxu0 %v1452_v38 }
 0xd21   :  { %v1269_v45 = vmul.f32 %v1781_v31, %v1268_v57  ;;  %v1783_v44 = vpop.eup %1782 }
 0xd22   :  { %1475 = vmatpush.msrb.mxu0 %v1451_v21  ;;  %v1402_v47 = vmul.f32 %v1783_v44, %v1401_v46 }
 0xd23   :  { %v1155_v51 = vpop.permute.xlu1 %1154 }
 0xd24   :  { %v1157_v23 = vmul.f32 %v1155_v51, %v1136_v7  ;;  %1476 = vmatpush.msrb.mxu0 %v1450_v39 }
 0xd25   :  { %v1288_v35 = vpop.permute.xlu0 %1287 }
 0xd26   :  { %v1158_v37 = vadd.f32 %v1157_v23, %v1151_v55  ;;  %v1290_v22 = vmul.f32 %v1288_v35, %v1269_v45 }
 0xd28   :  { %v1284_v0 = vmul.f32 %v1282_v53, %v1158_v37 }
 0xd2a   :  { %v1291_v32 = vadd.f32 %v1290_v22, %v1284_v0 }
 0xd6f   :  { %v1421_v3 = vpop.permute.xlu2 %1420 }
 0xd70   :  { %v1423_v61 = vmul.f32 %v1421_v3, %v1402_v47 }
 0xd77   :  { %v1432_v50 = vpop.permute.xlu2 %1431 }
 0xd78   :  { %1434 = vst.msk [vmem:[#allocation4] sm:$0xff] %vm101_vm0, %v1432_v50 }
 0xd86   :  { %v1415_v41 = vpop.permute.xlu1 %1414 }
 0xd87   :  { %v1417_v62 = vmul.f32 %v1415_v41, %v1291_v32 }
 0xd89   :  { %v1424_v2 = vadd.f32 %v1423_v61, %v1417_v62 }
 0xd8b   :  { %1439 = vst.msk [vmem:[#allocation7] sm:$0xff] %vm107_vm9, %v1424_v2 }
 0xd8e   :  { %v1427_v58 = vpop.permute.xlu1 %1426 }
 0xd8f   :  { %1429 = vst.msk [vmem:[#allocation3] sm:$0xff] %vm101_vm0, %v1427_v58 }
 0xd91   :  { %v1447_v42 = vpop.permute.xlu0 %1446 }
 0xd92   :  { %v1449_v29 = vmul.f32 %v1447_v42, %v1424_v2 }
 0xd94   :  { %1607 = vmatmul.msk.f32.vlgmr.msrb.gmra.mxu0 %vm107_vm9, %v1449_v29 }
 0xe11   :  { %v1478_v63 = vpop.f32.mrf.mxu0 }
 0xe12   :  { %v1479_v6 = vadd.f32 %v1637_v5, %v1478_v63 }
 0xe14   :  { %1481 = vst [vmem:[#allocation16] sm:$0xff] %v1479_v6 }
 0xe15   :  { %1492 = dma.vmem_to_hbm [thread:$0]  %s1488_s0, 128, %s1490_s29, [#allocation10]  }
 0xe16   :  { %1910 = dma.done.wait [#allocation10], 128  }
 0xe17   :  { %1911 = vsyncadd [#allocation10], 4294967168 }
 0xe18   :  { %1497 = vsyncpa [#allocation9], 1 }
 0xe19   :  { %1498 = vsyncpa [#allocation12], 1 }
 0xe1a   :  { %1499 = vsyncpa [#allocation15], 1 }
 0xe1b   :  { %1500 = vsyncpa [#allocation10], 1 }

</bundles_post_ra>
